<compile_context>
chip_gen: v7x
topology: tpu7x:2x2x1
jax: 0.10.0
libtpu: 0.0.40
codegen_flags: <defaults>
</compile_context>

<pallas_src>
import math

import jax
import jax.numpy as jnp
from jax import lax
from jax.experimental import pallas as pl
from jax.experimental.pallas import tpu as pltpu

# Vocab sizes from TemporalEmbedding.__init__ (size + 2 padding slots each) -> total 497
VOCABS = (365 + 2, 31 + 2, 7 + 2, 24 + 2, 60 + 2)
OFFSETS = tuple(int(sum(VOCABS[:f])) for f in range(5))
FUSED_VOCAB = 512  # 497 padded up to an MXU-friendly K (multiple of 256); rows 497..511 are zeros


def _round_up(a, b):
    return (a + b - 1) // b * b


def _split_hi_lo(x_f32):
    """f32 -> (bf16 hi, bf16 lo) with hi + lo ~= x to ~2^-16 relative."""
    hi = x_f32.astype(jnp.bfloat16)
    lo = (x_f32 - hi.astype(jnp.float32)).astype(jnp.bfloat16)
    return hi, lo


def _build_right_matrices(fused_table_f32, w_flat_f32, kx):
    """Stack [tables ; conv weight] into the two bf16 RHS matrices.

    LHS columns are [one-hot(512) | xw_hi(kc) | xw_lo(kc) | 0-pad], so:
      LHS @ R_hi = onehot@T_hi + xw_hi@W_hi + xw_lo@W_hi
      LHS @ R_lo = onehot@T_lo + xw_hi@W_lo
    Summed in f32 this recovers gather + conv to ~2^-16 relative (lo*lo dropped).
    """
    kc, d = w_flat_f32.shape
    t_hi, t_lo = _split_hi_lo(fused_table_f32)     # (512, D)
    w_hi, w_lo = _split_hi_lo(w_flat_f32)          # (kc, D)
    pad = jnp.zeros((kx - 2 * kc, d), jnp.bfloat16)
    zkc = jnp.zeros((kc, d), jnp.bfloat16)
    r_hi = jnp.concatenate([t_hi, w_hi, w_hi, pad], axis=0)
    r_lo = jnp.concatenate([t_lo, w_lo, zkc, pad], axis=0)
    return r_hi, r_lo


# ---------------------------------------------------------------------------
# Fused embedding kernel: one (L-tile, batch) grid step.
#   xw_ref  (1, tl, Kx) bf16 : [xw_hi | xw_lo | 0-pad] circular-conv im2col window
#   idx_ref (1, tl, 5)  i32  : time indices, per-feature offsets pre-added
#   pe_ref  (tl, D)     f32  : positional rows (block constant across inner b axis)
#   rhi_ref (Kr, D)     bf16 : [T_hi ; W_hi ; W_hi ; 0]   (constant block)
#   rlo_ref (Kr, D)     bf16 : [T_lo ; W_lo ;  0  ; 0]    (constant block)
#   o_ref   (1, tl, D)
# ---------------------------------------------------------------------------
def fused_embed_kernel(xw_ref, idx_ref, pe_ref, rhi_ref, rlo_ref, o_ref):
    idx = idx_ref[0]                          # (tl, 5) int32
    tl = idx.shape[0]
    kx = xw_ref.shape[-1]
    v = rhi_ref.shape[0] - kx                 # fused vocab = 512

    # One-hot over the fused vocabulary. The 5 per-feature index ranges are
    # disjoint, so OR of the compares equals their sum. int32 compares (v5e-safe),
    # bf16 one-hot (0/1 are bf16-exact, halves the temporary).
    iota = lax.broadcasted_iota(jnp.int32, (tl, v), 1)
    hit = iota == idx[:, 0:1]
    for f in range(1, 5):
        hit = jnp.logical_or(hit, iota == idx[:, f:f + 1])
    onehot = hit.astype(jnp.bfloat16)

    # Single fused LHS: gather one-hot + hi/lo conv columns share one K axis.
    left = jnp.concatenate([onehot, xw_ref[0]], axis=1)          # (tl, Kr) bf16

    # Two plain bf16 MXU passes, f32 accumulation (replaces the 6-pass HIGHEST dot).
    acc = jnp.dot(left, rhi_ref[...], preferred_element_type=jnp.float32)
    acc = acc + jnp.dot(left, rlo_ref[...], preferred_element_type=jnp.float32)
    acc = acc + pe_ref[...]
    # NOTE: for D < 128 this store is lane-masked; relayout only pays if stores bind.
    o_ref[0] = acc.astype(o_ref.dtype)


def _pallas_embed_call(xw2_f, idx_f, pe_f, r_hi, r_lo, *, tl, out_dtype,
                       single_buffer_tables):
    B, Lp, kx = xw2_f.shape
    kr, D = r_hi.shape
    table_kw = {"pipeline_mode": pl.Buffered(1)} if single_buffer_tables else {}

    grid_spec = pltpu.PrefetchScalarGridSpec(
        num_scalar_prefetch=0,
        grid=(Lp // tl, B),                    # L-tiles outer, batch inner
        in_specs=[
            pl.BlockSpec((1, tl, kx), lambda j, b: (b, j, 0)),
            pl.BlockSpec((1, tl, 5), lambda j, b: (b, j, 0)),
            # pe block index is constant across the inner batch axis -> DMA'd
            # once per L-tile; no (B, L, D) broadcast is ever materialized.
            pl.BlockSpec((tl, D), lambda j, b: (j, 0)),
            pl.BlockSpec((kr, D), lambda j, b: (0, 0), **table_kw),
            pl.BlockSpec((kr, D), lambda j, b: (0, 0), **table_kw),
        ],
        out_specs=pl.BlockSpec((1, tl, D), lambda j, b: (b, j, 0)),
    )
    return pl.pallas_call(
        fused_embed_kernel,
        out_shape=jax.ShapeDtypeStruct((B, Lp, D), out_dtype),
        grid_spec=grid_spec,
        compiler_params=pltpu.CompilerParams(
            dimension_semantics=("parallel", "parallel"),
            # v5e's 16 MiB scoped default is the binding one at large d_model.
            vmem_limit_bytes=64 * 1024 * 1024,
        ),
    )(xw2_f, idx_f, pe_f, r_hi, r_lo)


# ---------------------------------------------------------------------------
# Wrapper: TokenEmbedding + PositionalEmbedding + TemporalEmbedding for one stream.
# ---------------------------------------------------------------------------
def fused_embedding(x_val, time_idx, w_conv, fused_table, pe,
                    *, use_position=True, use_time=True, tl_max=512,
                    out_dtype=jnp.float32):
    """x_val: [B,L,c_in]; time_idx: [B,L,5] int; w_conv: [D,c_in,3] (torch layout);
    fused_table: [FUSED_VOCAB, D] f32; pe: [max_len, D] f32. Returns [B,L,D]."""
    B, L, c_in = x_val.shape
    D = w_conv.shape[0]
    kc = 3 * c_in
    kx = _round_up(max(2 * kc, 1), 128)        # lane-aligned hi/lo im2col width

    # --- im2col for the circular conv (kernel_size=3, padding=1, circular) ----
    x_val = x_val.astype(jnp.float32)
    x_prev = jnp.roll(x_val, 1, axis=1)        # x[(t-1) mod L]
    x_next = jnp.roll(x_val, -1, axis=1)       # x[(t+1) mod L]
    x_win = jnp.concatenate([x_prev, x_val, x_next], axis=-1)        # [B,L,3*c_in]
    xw_hi, xw_lo = _split_hi_lo(x_win)
    xw2 = jnp.concatenate([xw_hi, xw_lo], axis=-1)                   # [B,L,2*kc] bf16

    # --- stacked bf16 hi/lo RHS: [temporal tables ; conv weight] --------------
    w_flat = jnp.transpose(w_conv.astype(jnp.float32), (2, 1, 0)).reshape(kc, D)
    r_hi, r_lo = _build_right_matrices(fused_table.astype(jnp.float32), w_flat, kx)

    # --- temporal indices: add per-feature offsets into the fused vocab -------
    if use_time:
        # TODO(synk): no bounds check -- out-of-range indices silently alias a
        # neighboring feature's table region instead of raising like PyTorch.
        idx = time_idx.astype(jnp.int32) + jnp.asarray(OFFSETS, jnp.int32)
    else:
        # point every feature at a zero-padded row -> contributes exactly 0
        idx = jnp.full((B, L, 5), FUSED_VOCAB - 1, jnp.int32)

    # --- L tiling: multiple-of-8 sublanes, >=2 L-tiles when L >= 16 -----------
    tl = max(8, min(tl_max, _round_up(-(-L // 2), 8)))
    Lp = _round_up(L, tl)

    # Padded tail rows are garbage-but-finite; correctness relies on the [:, :L]
    # slice below -- keep that invariant if the padding/grid logic changes.
    xw2_f = jnp.pad(xw2, ((0, 0), (0, Lp - L), (0, kx - 2 * kc)))
    idx_f = jnp.pad(idx, ((0, 0), (0, Lp - L), (0, 0)))
    if use_position:
        pe_f = jnp.pad(pe[:L].astype(jnp.float32), ((0, Lp - L), (0, 0)))
    else:
        pe_f = jnp.zeros((Lp, D), jnp.float32)

    try:
        out = _pallas_embed_call(xw2_f, idx_f, pe_f, r_hi, r_lo, tl=tl,
                                 out_dtype=out_dtype, single_buffer_tables=True)
    except Exception:
        # pipeline_mode=pl.Buffered(1) (single-buffer the constant tables; a v7x
        # VMEM-headroom win) unsupported on this jax -> plain double buffering.
        out = _pallas_embed_call(xw2_f, idx_f, pe_f, r_hi, r_lo, tl=tl,
                                 out_dtype=out_dtype, single_buffer_tables=False)
    return out[:, :L, :]


# ---------------------------------------------------------------------------
# Parameter builders (mirror the PyTorch module's buffers / weights).
# ---------------------------------------------------------------------------
def make_fused_table(tables):
    d_model = tables[0].shape[1]
    fused = jnp.zeros((FUSED_VOCAB, d_model), jnp.float32)
    for off, t in zip(OFFSETS, tables):
        fused = fused.at[off:off + t.shape[0], :].set(t.astype(jnp.float32))
    return fused


def make_positional_table(d_model, max_len=5000):
    position = jnp.arange(max_len, dtype=jnp.float32)[:, None]
    # NOTE: log(100.0) intentionally matches the module's (non-standard) constant.
    div_term = jnp.exp(jnp.arange(0, d_model, 2, dtype=jnp.float32)
                       * (-(math.log(100.0) / d_model)))
    pe = jnp.zeros((max_len, d_model), jnp.float32)
    pe = pe.at[:, 0::2].set(jnp.sin(position * div_term))
    pe = pe.at[:, 1::2].set(jnp.cos(position * div_term))
    return pe


# ---------------------------------------------------------------------------
# BeginEmbded.forward
# ---------------------------------------------------------------------------
def begin_embed_forward(params, batch_en_x, batch_en_time, seasonal_init,
                        batch_den_time, trend_init, *, target_dim,
                        use_position=True, use_time=True, out_dtype=jnp.float32):
    enc = fused_embedding(batch_en_x, batch_en_time,
                          params["enc_conv_w"], params["enc_table"], params["pe"],
                          use_position=use_position, use_time=use_time,
                          out_dtype=out_dtype)
    den = fused_embedding(seasonal_init, batch_den_time,
                          params["denc_conv_w"], params["denc_table"], params["pe"],
                          use_position=use_position, use_time=use_time,
                          out_dtype=out_dtype)
    trend = trend_init[:, :, target_dim:target_dim + 1]
    # self.dropout is constructed in the module but never applied in forward().
    # TODO(synk): args.weatherSTList -> STList.append(numpy slice) is a host-side
    # Python list side effect with no in-graph / Pallas equivalent; skipped.
    return enc, den, trend


# ---------------------------------------------------------------------------
# Pure-JAX reference (same semantics as the PyTorch forward, full f32).
# ---------------------------------------------------------------------------
def _ref_token_embed(x, w_conv):
    # torch Conv1d (cross-correlation), circular padding of 1 on each side.
    x_pad = jnp.concatenate([x[:, -1:, :], x, x[:, :1, :]], axis=1)
    return lax.conv_general_dilated(
        x_pad, w_conv, window_strides=(1,), padding="VALID",
        dimension_numbers=("NWC", "OIW", "NWC"),
        precision=lax.Precision.HIGHEST)


def _ref_temporal(time_idx, tables):
    xi = time_idx.astype(jnp.int32)
    return sum(tables[f][xi[:, :, f]] for f in range(5))


if __name__ == "__main__":
    B, L_enc, L_dec, c_in, d_model = 2, 8, 12, 4, 32
    target_dim = 1

    keys = list(jax.random.split(jax.random.PRNGKey(0), 32))
    nxt = lambda: keys.pop()

    def normal(shape):
        return jax.random.normal(nxt(), shape, dtype=jnp.float32)

    # Parameters (nn.Embedding default N(0,1); conv weights arbitrary normals)
    enc_tables = tuple(normal((VOCABS[f], d_model)) for f in range(5))
    denc_tables = tuple(normal((VOCABS[f], d_model)) for f in range(5))
    enc_conv_w = normal((d_model, c_in, 3)) * 0.2
    denc_conv_w = normal((d_model, c_in, 3)) * 0.2
    pe = make_positional_table(d_model)

    params = {
        "enc_conv_w": enc_conv_w,
        "denc_conv_w": denc_conv_w,
        "enc_table": make_fused_table(enc_tables),
        "denc_table": make_fused_table(denc_tables),
        "pe": pe,
    }

    # Inputs
    batch_en_x = normal((B, L_enc, c_in))
    seasonal_init = normal((B, L_dec, c_in))
    trend_init = normal((B, L_dec, c_in))

    def rand_time(b, l):
        cols = [jax.random.randint(nxt(), (b, l, 1), 0, VOCABS[f], dtype=jnp.int32)
                for f in range(5)]
        return jnp.concatenate(cols, axis=-1)

    batch_en_time = rand_time(B, L_enc)
    batch_den_time = rand_time(B, L_dec)

    enc, den, trend = begin_embed_forward(
        params, batch_en_x, batch_en_time, seasonal_init, batch_den_time,
        trend_init, target_dim=target_dim, use_position=True, use_time=True)
    enc, den, trend = jax.block_until_ready((enc, den, trend))

    # Reference (exact f32).
    ref_enc = (_ref_token_embed(batch_en_x, enc_conv_w)
               + pe[None, :L_enc]
               + _ref_temporal(batch_en_time, enc_tables))
    ref_den = (_ref_token_embed(seasonal_init, denc_conv_w)
               + pe[None, :L_dec]
               + _ref_temporal(batch_den_time, denc_tables))
    ref_trend = trend_init[:, :, target_dim:target_dim + 1]

    assert enc.shape == (B, L_enc, d_model)
    assert den.shape == (B, L_dec, d_model)
    assert trend.shape == (B, L_dec, 1)
    # The bf16 hi/lo split reproduces each gathered/convolved f32 term to ~2^-16
    # relative (vs bit-exact HIGHEST), so the tolerance is ~1e-4-level absolute.
    assert jnp.allclose(enc, ref_enc, atol=5e-4, rtol=1e-3), \
        float(jnp.max(jnp.abs(enc - ref_enc)))
    assert jnp.allclose(den, ref_den, atol=5e-4, rtol=1e-3), \
        float(jnp.max(jnp.abs(den - ref_den)))
    assert jnp.allclose(trend, ref_trend)

    print("KERNEL_OK")
</pallas_src>

<mosaic_0001>
module attributes {stable_mosaic.version = 11 : i64} {
  func.func @fused_embed_kernel(%arg0: i32, %arg1: i32, %arg2: memref<1x8x128xbf16, #tpu.memory_space<vmem>>, %arg3: memref<1x8x5xi32, #tpu.memory_space<vmem>>, %arg4: memref<8x32xf32, #tpu.memory_space<vmem>>, %arg5: memref<640x32xbf16, #tpu.memory_space<vmem>>, %arg6: memref<640x32xbf16, #tpu.memory_space<vmem>>, %arg7: memref<1x8x32xf32, #tpu.memory_space<vmem>>) attributes {dimension_semantics = [#tpu.dimension_semantics<parallel>, #tpu.dimension_semantics<parallel>], iteration_bounds = array<i64: 1, 2>, scalar_prefetch = 0 : i64, scratch_operands = 0 : i64, tpu.core_type = #tpu.core_type<tc>, window_params = [{transform_indices = @transform_0, window_bounds = array<i64: 1, 8, 128>}, {transform_indices = @transform_1, window_bounds = array<i64: 1, 8, 5>}, {transform_indices = @transform_2, window_bounds = array<i64: 8, 32>}, {pipeline_mode = #tpu.pipeline_mode<synchronous>, transform_indices = @transform_3, window_bounds = array<i64: 640, 32>}, {pipeline_mode = #tpu.pipeline_mode<synchronous>, transform_indices = @transform_4, window_bounds = array<i64: 640, 32>}, {transform_indices = @transform_5, window_bounds = array<i64: 1, 8, 32>}]} {
    %c0 = arith.constant 0 : index
    %c0_0 = arith.constant 0 : index
    %c0_1 = arith.constant 0 : index
    %0 = vector.load %arg3[%c0, %c0_0, %c0_1] : memref<1x8x5xi32, #tpu.memory_space<vmem>>, vector<1x8x5xi32>
    %1 = vector.shape_cast %0 : vector<1x8x5xi32> to vector<8x5xi32>
    %2 = tpu.iota {dimensions = array<i32: 1>} : vector<8x512xi32>
    %3 = vector.extract_strided_slice %1 {offsets = [0, 0], sizes = [8, 1], strides = [1, 1]} : vector<8x5xi32> to vector<8x1xi32>
    %4 = vector.broadcast %3 : vector<8x1xi32> to vector<8x512xi32>
    %5 = arith.cmpi eq, %2, %4 : vector<8x512xi32>
    %6 = vector.extract_strided_slice %1 {offsets = [0, 1], sizes = [8, 1], strides = [1, 1]} : vector<8x5xi32> to vector<8x1xi32>
    %7 = vector.broadcast %6 : vector<8x1xi32> to vector<8x512xi32>
    %8 = arith.cmpi eq, %2, %7 : vector<8x512xi32>
    %9 = arith.ori %5, %8 : vector<8x512xi1>
    %10 = vector.extract_strided_slice %1 {offsets = [0, 2], sizes = [8, 1], strides = [1, 1]} : vector<8x5xi32> to vector<8x1xi32>
    %11 = vector.broadcast %10 : vector<8x1xi32> to vector<8x512xi32>
    %12 = arith.cmpi eq, %2, %11 : vector<8x512xi32>
    %13 = arith.ori %9, %12 : vector<8x512xi1>
    %14 = vector.extract_strided_slice %1 {offsets = [0, 3], sizes = [8, 1], strides = [1, 1]} : vector<8x5xi32> to vector<8x1xi32>
    %15 = vector.broadcast %14 : vector<8x1xi32> to vector<8x512xi32>
    %16 = arith.cmpi eq, %2, %15 : vector<8x512xi32>
    %17 = arith.ori %13, %16 : vector<8x512xi1>
    %18 = vector.extract_strided_slice %1 {offsets = [0, 4], sizes = [8, 1], strides = [1, 1]} : vector<8x5xi32> to vector<8x1xi32>
    %19 = vector.broadcast %18 : vector<8x1xi32> to vector<8x512xi32>
    %20 = arith.cmpi eq, %2, %19 : vector<8x512xi32>
    %21 = arith.ori %17, %20 : vector<8x512xi1>
    %22 = arith.extui %21 : vector<8x512xi1> to vector<8x512xi32>
    %23 = arith.sitofp %22 : vector<8x512xi32> to vector<8x512xf32>
    %24 = arith.truncf %23 : vector<8x512xf32> to vector<8x512xbf16>
    %c0_2 = arith.constant 0 : index
    %c0_3 = arith.constant 0 : index
    %c0_4 = arith.constant 0 : index
    %25 = vector.load %arg2[%c0_2, %c0_3, %c0_4] : memref<1x8x128xbf16, #tpu.memory_space<vmem>>, vector<1x8x128xbf16>
    %26 = vector.shape_cast %25 : vector<1x8x128xbf16> to vector<8x128xbf16>
    %27 = tpu.concatenate %24, %26 in 1 : vector<8x512xbf16>, vector<8x128xbf16> -> vector<8x640xbf16>
    %c0_5 = arith.constant 0 : index
    %c0_6 = arith.constant 0 : index
    %28 = vector.load %arg5[%c0_5, %c0_6] : memref<640x32xbf16, #tpu.memory_space<vmem>>, vector<640x32xbf16>
    %cst = arith.constant dense<0.000000e+00> : vector<8x32xf32>
    %29 = tpu.matmul %27, %28, %cst {dimension_numbers = #tpu.dot_dimension_numbers<[1], [0], [0], [1], [0, 0, 1, 1], [], []>} : vector<8x640xbf16>, vector<640x32xbf16>, vector<8x32xf32> -> vector<8x32xf32>
    %c0_7 = arith.constant 0 : index
    %c0_8 = arith.constant 0 : index
    %30 = vector.load %arg6[%c0_7, %c0_8] : memref<640x32xbf16, #tpu.memory_space<vmem>>, vector<640x32xbf16>
    %cst_9 = arith.constant dense<0.000000e+00> : vector<8x32xf32>
    %31 = tpu.matmul %27, %30, %cst_9 {dimension_numbers = #tpu.dot_dimension_numbers<[1], [0], [0], [1], [0, 0, 1, 1], [], []>} : vector<8x640xbf16>, vector<640x32xbf16>, vector<8x32xf32> -> vector<8x32xf32>
    %32 = arith.addf %29, %31 : vector<8x32xf32>
    %c0_10 = arith.constant 0 : index
    %c0_11 = arith.constant 0 : index
    %33 = vector.load %arg4[%c0_10, %c0_11] : memref<8x32xf32, #tpu.memory_space<vmem>>, vector<8x32xf32>
    %34 = arith.addf %32, %33 : vector<8x32xf32>
    %c0_12 = arith.constant 0 : index
    %c0_13 = arith.constant 0 : index
    %c0_14 = arith.constant 0 : index
    %35 = vector.load %arg7[%c0_12, %c0_13, %c0_14] : memref<1x8x32xf32, #tpu.memory_space<vmem>>, vector<1x8x32xf32>
    %36 = vector.shape_cast %35 : vector<1x8x32xf32> to vector<8x32xf32>
    %37 = vector.shape_cast %34 : vector<8x32xf32> to vector<1x8x32xf32>
    tpu.vector_store %arg7[%c0_12, %c0_13, %c0_14], %37 {strides = array<i32>} : memref<1x8x32xf32, #tpu.memory_space<vmem>>, vector<1x8x32xf32>,
    return
  }
  func.func @transform_0(%arg0: i32, %arg1: i32) -> (i32, i32, i32) {
    %c0_i32 = arith.constant 0 : i32
    %c0_i32_0 = arith.constant 0 : i32
    return %arg1, %arg0, %c0_i32 : i32, i32, i32
  }
  func.func @transform_1(%arg0: i32, %arg1: i32) -> (i32, i32, i32) {
    %c0_i32 = arith.constant 0 : i32
    %c0_i32_0 = arith.constant 0 : i32
    return %arg1, %arg0, %c0_i32 : i32, i32, i32
  }
  func.func @transform_2(%arg0: i32, %arg1: i32) -> (i32, i32) {
    %c0_i32 = arith.constant 0 : i32
    %c0_i32_0 = arith.constant 0 : i32
    return %arg0, %c0_i32 : i32, i32
  }
  func.func @transform_3(%arg0: i32, %arg1: i32) -> (i32, i32) {
    %c0_i32 = arith.constant 0 : i32
    %c0_i32_0 = arith.constant 0 : i32
    %c0_i32_1 = arith.constant 0 : i32
    return %c0_i32, %c0_i32_0 : i32, i32
  }
  func.func @transform_4(%arg0: i32, %arg1: i32) -> (i32, i32) {
    %c0_i32 = arith.constant 0 : i32
    %c0_i32_0 = arith.constant 0 : i32
    %c0_i32_1 = arith.constant 0 : i32
    return %c0_i32, %c0_i32_0 : i32, i32
  }
  func.func @transform_5(%arg0: i32, %arg1: i32) -> (i32, i32, i32) {
    %c0_i32 = arith.constant 0 : i32
    %c0_i32_0 = arith.constant 0 : i32
    return %arg1, %arg0, %c0_i32 : i32, i32, i32
  }
}

module attributes {stable_mosaic.version = 11 : i64} {
  func.func @fused_embed_kernel(%arg0: i32, %arg1: i32, %arg2: memref<1x8x128xbf16, #tpu.memory_space<vmem>>, %arg3: memref<1x8x5xi32, #tpu.memory_space<vmem>>, %arg4: memref<8x32xf32, #tpu.memory_space<vmem>>, %arg5: memref<640x32xbf16, #tpu.memory_space<vmem>>, %arg6: memref<640x32xbf16, #tpu.memory_space<vmem>>, %arg7: memref<1x8x32xf32, #tpu.memory_space<vmem>>) attributes {dimension_semantics = [#tpu.dimension_semantics<parallel>, #tpu.dimension_semantics<parallel>], iteration_bounds = array<i64: 1, 2>, scalar_prefetch = 0 : i64, scratch_operands = 0 : i64, tpu.core_type = #tpu.core_type<tc>, window_params = [{transform_indices = @transform_0, window_bounds = array<i64: 1, 8, 128>}, {transform_indices = @transform_1, window_bounds = array<i64: 1, 8, 5>}, {transform_indices = @transform_2, window_bounds = array<i64: 8, 32>}, {pipeline_mode = #tpu.pipeline_mode<synchronous>, transform_indices = @transform_3, window_bounds = array<i64: 640, 32>}, {pipeline_mode = #tpu.pipeline_mode<synchronous>, transform_indices = @transform_4, window_bounds = array<i64: 640, 32>}, {transform_indices = @transform_5, window_bounds = array<i64: 1, 8, 32>}]} {
    %c0 = arith.constant 0 : index
    %c0_0 = arith.constant 0 : index
    %c0_1 = arith.constant 0 : index
    %0 = vector.load %arg3[%c0, %c0_0, %c0_1] : memref<1x8x5xi32, #tpu.memory_space<vmem>>, vector<1x8x5xi32>
    %1 = vector.shape_cast %0 : vector<1x8x5xi32> to vector<8x5xi32>
    %2 = tpu.iota {dimensions = array<i32: 1>} : vector<8x512xi32>
    %3 = vector.extract_strided_slice %1 {offsets = [0, 0], sizes = [8, 1], strides = [1, 1]} : vector<8x5xi32> to vector<8x1xi32>
    %4 = vector.broadcast %3 : vector<8x1xi32> to vector<8x512xi32>
    %5 = arith.cmpi eq, %2, %4 : vector<8x512xi32>
    %6 = vector.extract_strided_slice %1 {offsets = [0, 1], sizes = [8, 1], strides = [1, 1]} : vector<8x5xi32> to vector<8x1xi32>
    %7 = vector.broadcast %6 : vector<8x1xi32> to vector<8x512xi32>
    %8 = arith.cmpi eq, %2, %7 : vector<8x512xi32>
    %9 = arith.ori %5, %8 : vector<8x512xi1>
    %10 = vector.extract_strided_slice %1 {offsets = [0, 2], sizes = [8, 1], strides = [1, 1]} : vector<8x5xi32> to vector<8x1xi32>
    %11 = vector.broadcast %10 : vector<8x1xi32> to vector<8x512xi32>
    %12 = arith.cmpi eq, %2, %11 : vector<8x512xi32>
    %13 = arith.ori %9, %12 : vector<8x512xi1>
    %14 = vector.extract_strided_slice %1 {offsets = [0, 3], sizes = [8, 1], strides = [1, 1]} : vector<8x5xi32> to vector<8x1xi32>
    %15 = vector.broadcast %14 : vector<8x1xi32> to vector<8x512xi32>
    %16 = arith.cmpi eq, %2, %15 : vector<8x512xi32>
    %17 = arith.ori %13, %16 : vector<8x512xi1>
    %18 = vector.extract_strided_slice %1 {offsets = [0, 4], sizes = [8, 1], strides = [1, 1]} : vector<8x5xi32> to vector<8x1xi32>
    %19 = vector.broadcast %18 : vector<8x1xi32> to vector<8x512xi32>
    %20 = arith.cmpi eq, %2, %19 : vector<8x512xi32>
    %21 = arith.ori %17, %20 : vector<8x512xi1>
    %22 = arith.extui %21 : vector<8x512xi1> to vector<8x512xi32>
    %23 = arith.sitofp %22 : vector<8x512xi32> to vector<8x512xf32>
    %24 = arith.truncf %23 : vector<8x512xf32> to vector<8x512xbf16>
    %c0_2 = arith.constant 0 : index
    %c0_3 = arith.constant 0 : index
    %c0_4 = arith.constant 0 : index
    %25 = vector.load %arg2[%c0_2, %c0_3, %c0_4] : memref<1x8x128xbf16, #tpu.memory_space<vmem>>, vector<1x8x128xbf16>
    %26 = vector.shape_cast %25 : vector<1x8x128xbf16> to vector<8x128xbf16>
    %27 = tpu.concatenate %24, %26 in 1 : vector<8x512xbf16>, vector<8x128xbf16> -> vector<8x640xbf16>
    %c0_5 = arith.constant 0 : index
    %c0_6 = arith.constant 0 : index
    %28 = vector.load %arg5[%c0_5, %c0_6] : memref<640x32xbf16, #tpu.memory_space<vmem>>, vector<640x32xbf16>
    %cst = arith.constant dense<0.000000e+00> : vector<8x32xf32>
    %29 = tpu.matmul %27, %28, %cst {dimension_numbers = #tpu.dot_dimension_numbers<[1], [0], [0], [1], [0, 0, 1, 1], [], []>} : vector<8x640xbf16>, vector<640x32xbf16>, vector<8x32xf32> -> vector<8x32xf32>
    %c0_7 = arith.constant 0 : index
    %c0_8 = arith.constant 0 : index
    %30 = vector.load %arg6[%c0_7, %c0_8] : memref<640x32xbf16, #tpu.memory_space<vmem>>, vector<640x32xbf16>
    %cst_9 = arith.constant dense<0.000000e+00> : vector<8x32xf32>
    %31 = tpu.matmul %27, %30, %cst_9 {dimension_numbers = #tpu.dot_dimension_numbers<[1], [0], [0], [1], [0, 0, 1, 1], [], []>} : vector<8x640xbf16>, vector<640x32xbf16>, vector<8x32xf32> -> vector<8x32xf32>
    %32 = arith.addf %29, %31 : vector<8x32xf32>
    %c0_10 = arith.constant 0 : index
    %c0_11 = arith.constant 0 : index
    %33 = vector.load %arg4[%c0_10, %c0_11] : memref<8x32xf32, #tpu.memory_space<vmem>>, vector<8x32xf32>
    %34 = arith.addf %32, %33 : vector<8x32xf32>
    %c0_12 = arith.constant 0 : index
    %c0_13 = arith.constant 0 : index
    %c0_14 = arith.constant 0 : index
    %35 = vector.load %arg7[%c0_12, %c0_13, %c0_14] : memref<1x8x32xf32, #tpu.memory_space<vmem>>, vector<1x8x32xf32>
    %36 = vector.shape_cast %35 : vector<1x8x32xf32> to vector<8x32xf32>
    %37 = vector.shape_cast %34 : vector<8x32xf32> to vector<1x8x32xf32>
    tpu.vector_store %arg7[%c0_12, %c0_13, %c0_14], %37 {strides = array<i32>} : memref<1x8x32xf32, #tpu.memory_space<vmem>>, vector<1x8x32xf32>,
    return
  }
  func.func @transform_0(%arg0: i32, %arg1: i32) -> (i32, i32, i32) {
    %c0_i32 = arith.constant 0 : i32
    %c0_i32_0 = arith.constant 0 : i32
    return %arg1, %arg0, %c0_i32 : i32, i32, i32
  }
  func.func @transform_1(%arg0: i32, %arg1: i32) -> (i32, i32, i32) {
    %c0_i32 = arith.constant 0 : i32
    %c0_i32_0 = arith.constant 0 : i32
    return %arg1, %arg0, %c0_i32 : i32, i32, i32
  }
  func.func @transform_2(%arg0: i32, %arg1: i32) -> (i32, i32) {
    %c0_i32 = arith.constant 0 : i32
    %c0_i32_0 = arith.constant 0 : i32
    return %arg0, %c0_i32 : i32, i32
  }
  func.func @transform_3(%arg0: i32, %arg1: i32) -> (i32, i32) {
    %c0_i32 = arith.constant 0 : i32
    %c0_i32_0 = arith.constant 0 : i32
    %c0_i32_1 = arith.constant 0 : i32
    return %c0_i32, %c0_i32_0 : i32, i32
  }
  func.func @transform_4(%arg0: i32, %arg1: i32) -> (i32, i32) {
    %c0_i32 = arith.constant 0 : i32
    %c0_i32_0 = arith.constant 0 : i32
    %c0_i32_1 = arith.constant 0 : i32
    return %c0_i32, %c0_i32_0 : i32, i32
  }
  func.func @transform_5(%arg0: i32, %arg1: i32) -> (i32, i32, i32) {
    %c0_i32 = arith.constant 0 : i32
    %c0_i32_0 = arith.constant 0 : i32
    return %arg1, %arg0, %c0_i32 : i32, i32, i32
  }
}

</mosaic_0001>

<bundles_post_ra>
// kernel: tpu_custom_call.1
= control target key start
LH: loop header
LB: loop body
LE: loop exit
PB: predicated region body
PF: predicated region fallthrough
CT: control target
= control target key end

     0   :  { %s2539_s0 = inlined_call_operand.hbm [shape: bf16[2,8,128], index: 0, kind: input, shape index: {}]   ;;  %s2540_s1 = inlined_call_operand.hbm [shape: s32[2,8,5], index: 1, kind: input, shape index: {}]   ;;  %s2541_s2 = inlined_call_operand.hbm [shape: f32[8,32], index: 2, kind: input, shape index: {}]   ;;  %s2542_s3 = inlined_call_operand.hbm [shape: bf16[640,32], index: 3, kind: input, shape index: {}]   ;;  %s2543_s4 = inlined_call_operand.hbm [shape: bf16[640,32], index: 4, kind: input, shape index: {}]   ;;  %s2544_s5 = inlined_call_operand.hbm [shape: f32[2,8,32], index: 5, kind: output, shape index: {}]  }
   0x1   :  { %2549 = sst [smem:[#allocation17_spill]] %s2539_s0 }
   0x2   :  { %2550 = sst [smem:[#allocation18_spill]] %s2541_s2 }
   0x3   :  { %2551 = sst [smem:[#allocation19_spill]] %s2542_s3 }
   0x4   :  { %10 = vsyncpa [#allocation3], 0 }
   0x5   :  { %12 = vsyncpa [#allocation3 + $0x1], 0 }
   0x6   :  { %13 = vsyncpa [#allocation6], 0 }
   0x7   :  { %15 = vsyncpa [#allocation6 + $0x1], 0 }
   0x8   :  { %16 = vsyncpa [#allocation9], 0 }
   0x9   :  { %17 = vsyncpa [#allocation4], 0 }
   0xa   :  { %19 = vsyncpa [#allocation4 + $0x1], 0  ;;  %s2179_s18 = smov 0   ;;  %s2181_s19 = smov 0  }
   0xb   :  { %s2183_s20 = smov 0   ;;  %s2185_s21 = smov 0  }
   0xc   :  { %s2187_s22 = smov 0   ;;  %s2189_s23 = smov 0  }
   0xd LB: > { %s2210_s24 = sadd.s32 4294967295, %s2132_s23   ;;  %s1450_s25 = sadd.s32 4294967294, %s2132_s23   ;;  %s2132_s23 = sphi %s2189_s23, %s25_s23   ;;  %s2128_s22 = sphi %s2187_s22, %s2583_s22   ;;  %s2124_s21 = sphi %s2185_s21, %s2582_s21   ;;  %s2120_s20 = sphi %s2183_s20, %s2581_s20   ;;  %s2116_s19 = sphi %s2181_s19, %s2580_s19   ;;  %s2112_s18 = sphi %s2179_s18, %s2579_s18  }
   0xe   : > { %p59_p0 = scmp.ne.s32.totalorder %s2116_s19, %s2112_s18  ;;  %p2545_p1 = scmp.eq.s32.totalorder %s2210_s24, 0 }
   0xf   : > { %p187_p3 = scmp.eq.s32.totalorder %s1450_s25, 1  ;;  %p1451_p5 = scmp.ge.s32.totalorder %s2132_s23, 1 }
  0x10   : > { %p2219_p4 = por %p2545_p1, %p59_p0  ;;  %p194_p7 = scmp.lt.s32.totalorder %s2132_s23, 3 }
  0x11   : > { %p2224_p6 = por %p187_p3, %p59_p0  ;;  %s2134_s29 = smov [#allocation7]  }
  0x12   : > { %s2552_s26 = scalar_select %p2219_p4, 1, 0 }
  0x13   : > { %s2553_s27 = scalar_select %p2224_p6, 1, 0 }
  0x14   : > { %p2229_p8 = pnand %p1451_p5, %p194_p7  ;;  %s209_s30 = sshll.u32 %s2134_s29, 4  ;;  %s210_s30 = int_to_ptr.vmem [resolvable:$true] %s209_s30 }
  0x15   : > { %s2135_s6 = smov [#allocation8]   ;;  %s2136_s9 = smov [#allocation10]  }
  0x16   : > { %s2554_s28 = scalar_select %p2229_p8, 1, 0 }
  0x17   : > { %p1719_p10 = pneg %p2229_p8  ;;  %s219_s7 = sshll.u32 %s2135_s6, 4  ;;  %s2242_s7 = int_to_ptr.vmem [resolvable:$true] %s219_s7 }
  0x18   : > { %s2244_s10 = sshll.u32 %s2136_s9, 4  ;;  %s2556_s2 = sld [smem:[#allocation18_spill]]  ;;  %s233_s10 = int_to_ptr.vmem [resolvable:$true] %s2244_s10 }
  0x19   : > { %p2238_p11 = pnand %p1719_p10, %p2545_p1 }
  0x1b   : > { %p2254_p13 = pneg %p2238_p11 }
  0x1e   : > { %s1894_s13 = scalar_lea.hbm %s2556_s2, 128 }
  0x1f   : > { %p1895_p12 = scmp.ne.s32.totalorder %s2556_s2, %s1894_s13  ;;  %p1901_p5 = scmp.lt.u32.totalorder %s1894_s13, %s2556_s2 }
  0x21   : > { %p1897_p0 = pnand %p2254_p13, %p1895_p12 }
  0x23   : > { %p1898_p3 = pneg %p1897_p0 }
  0x25   : > { %p1903_p7 = pnand %p1901_p5, %p1898_p3 }
  0x27   : > { %1906 = shalt.err (!%p1903_p7)
}
  0x28   : > { %s1907_s29 = scalar_lea.vmem %s210_s30, 128  ;;  %p1915_p2 = scmp.lt.s32.totalorder %s210_s30, %s210_s30 }
  0x29   : > { %p1908_p10 = scmp.ne.s32.totalorder %s210_s30, %s1907_s29  ;;  %p1916_p6 = scmp.lt.s32.totalorder %s1907_s29, %s1907_s29 }
  0x2b   : > { %p1910_p9 = pnand %p1908_p10, %p2254_p13  ;;  %p1917_p4 = por %p1916_p6, %p1915_p2 }
  0x2d   : > { %p1911_p1 = pneg %p1910_p9 }
  0x2f   : > { %p1918_p8 = pnand %p1917_p4, %p1911_p1 }
  0x31   : > { %1921 = shalt.err (!%p1918_p8)
}
  0x32   : > { %1722 = dma.hbm_to_vmem [thread:$0]  (!%p2238_p11), %s2556_s2, 128, %s210_s30, [#allocation6]  }
  0x33   : > { %s2558_s3 = sld [smem:[#allocation19_spill]] }
  0x39   : > { %s1922_s13 = scalar_lea.hbm %s2558_s3, 5120 }
  0x3a   : > { %p1923_p9 = scmp.ne.s32.totalorder %s2558_s3, %s1922_s13  ;;  %p1929_p1 = scmp.lt.u32.totalorder %s1922_s13, %s2558_s3 }
  0x3c   : > { %p1925_p12 = pnand %p1923_p9, %p2254_p13 }
  0x3e   : > { %p1926_p2 = pneg %p1925_p12 }
  0x40   : > { %p1931_p4 = pnand %p1929_p1, %p1926_p2 }
  0x42   : > { %1934 = shalt.err (!%p1931_p4)
}
  0x43   : > { %s1935_s30 = scalar_lea.vmem %s2242_s7, 5120  ;;  %p1943_p3 = scmp.lt.s32.totalorder %s2242_s7, %s2242_s7 }
  0x44   : > { %p1936_p6 = scmp.ne.s32.totalorder %s2242_s7, %s1935_s30  ;;  %p1944_p5 = scmp.lt.s32.totalorder %s1935_s30, %s1935_s30 }
  0x46   : > { %p1938_p8 = pnand %p1936_p6, %p2254_p13  ;;  %p1945_p7 = por %p1944_p5, %p1943_p3 }
  0x48   : > { %p1939_p0 = pneg %p1938_p8 }
  0x4a   : > { %p1946_p10 = pnand %p1945_p7, %p1939_p0 }
  0x4c   : > { %1949 = shalt.err (!%p1946_p10)
}
  0x4d   : > { %s2137_s29 = smov 64   ;;  %s2138_s6 = smov 4  }
  0x4e   : > { %1725 = dma.hbm_to_vmem [thread:$0]  (!%p2238_p11), %s2558_s3, 5120, %s2242_s7, [#allocation9], %s2137_s29, %s2137_s29, %s2138_s6  }
  0x4f   : > { %s1950_s14 = scalar_lea.hbm %s2543_s4, 5120 }
  0x50   : > { %p1951_p9 = scmp.ne.s32.totalorder %s2543_s4, %s1950_s14  ;;  %p1957_p1 = scmp.lt.u32.totalorder %s1950_s14, %s2543_s4 }
  0x52   : > { %p1953_p12 = pnand %p1951_p9, %p2254_p13 }
  0x54   : > { %p1954_p2 = pneg %p1953_p12 }
  0x56   : > { %p1959_p4 = pnand %p1957_p1, %p1954_p2 }
  0x58   : > { %1962 = shalt.err (!%p1959_p4)
}
  0x59   : > { %s1963_s9 = scalar_lea.vmem %s233_s10, 5120  ;;  %p1971_p3 = scmp.lt.s32.totalorder %s233_s10, %s233_s10 }
  0x5a   : > { %p1964_p6 = scmp.ne.s32.totalorder %s233_s10, %s1963_s9  ;;  %p1972_p5 = scmp.lt.s32.totalorder %s1963_s9, %s1963_s9 }
  0x5c   : > { %p1966_p8 = pnand %p1964_p6, %p2254_p13  ;;  %p1973_p7 = por %p1972_p5, %p1971_p3 }
  0x5e   : > { %p1967_p0 = pneg %p1966_p8 }
  0x60   : > { %p1974_p10 = pnand %p1973_p7, %p1967_p0 }
  0x62   : > { %1977 = shalt.err (!%p1974_p10)
}
  0x63   : > { %1728 = dma.hbm_to_vmem [thread:$0]  (!%p2238_p11), %s2543_s4, 5120, %s233_s10, [#allocation9], %s2137_s29, %s2137_s29, %s2138_s6  }
  0x64   : > { %s46_s16 = sadd.s32 1, %s2120_s20  ;;  %s34_s12 = sadd.s32 1, %s2128_s22 }
  0x65   : > { %p53_p13 = scmp.ne.s32.totalorder %s2120_s20, %s2116_s19  ;;  %p35_p9 = scmp.ge.s32.totalorder %s34_s12, 2 }
  0x66   : > { %p54_p12 = scmp.eq.s32.totalorder %s2132_s23, 0  ;;  %p2559_p2 = scmp.eq.s32.totalorder %s2210_s24, 1 }
  0x67   : > { %p1743_p4 = scmp.lt.s32.totalorder %s2132_s23, 2  ;;  %s2585_s12 = smov (%p35_p9, %s34_s12), 0 }
  0x68   : > { %p2319_p1 = por %p2559_p2, %p53_p13  ;;  %p55_p6 = por %p54_p12, %p53_p13 }
  0x69   : > { %s2327_s13 = sand.u32 1, %s2120_s20   ;;  %s41_s10 = ssub.s32 %s2128_s22, %s2585_s12 }
  0x6a   : > { %s2560_s8 = scalar_select %p2319_p1, 1, 0 }
  0x6b   : > { %p44_p11 = scmp.eq.s32.totalorder %s41_s10, 0  ;;  %s1456_s29 = sshll.u32 %s2327_s13, 2 }
  0x6c   : > { %s1457_s6 = sshll.u32 %s2128_s22, 6  ;;  %s2561_s0 = sld [smem:[#allocation17_spill]] }
  0x6d   : > { %s2334_s14 = scalar_select %p44_p11, %s2120_s20, %s46_s16  }
  0x6e   : > { %s250_s30 = scalar_lea.vmem [#allocation2], %s1456_s29  ;;  %p2345_p8 = pnand %p1743_p4, %p55_p6 }
  0x6f   : > { %s258_s9 = sshll.u32 %s250_s30, 4  ;;  %s1458_s16 = sshll.u32 %s2327_s13, 3  ;;  %s2341_s9 = int_to_ptr.vmem [resolvable:$true] %s258_s9 }
  0x70   : > { %s247_s10 = scalar_lea.sflag [#allocation3], %s2327_s13  ;;  %p1980_p3 = pneg %p2345_p8 }
  0x72   : > { %s2339_s25 = scalar_lea.hbm %s2561_s0, %s1457_s6  ;;  %s1983_s17 = scalar_lea.hbm %s2561_s0, 128 }
  0x73   : > { %s1978_s6 = scalar_lea.hbm %s2339_s25, 64  ;;  %p1984_p10 = scmp.lt.u32.totalorder %s2339_s25, %s2561_s0 }
  0x74   : > { %p1979_p0 = scmp.ne.s32.totalorder %s2339_s25, %s1978_s6  ;;  %p1985_p13 = scmp.lt.u32.totalorder %s1983_s17, %s1978_s6 }
  0x75   : > { %p1987_p12 = scmp.lt.u32.totalorder %s1978_s6, %s2339_s25 }
  0x76   : > { %p1981_p5 = pnand %p1980_p3, %p1979_p0  ;;  %p1986_p9 = por %p1985_p13, %p1984_p10 }
  0x78   : > { %p1982_p7 = pneg %p1981_p5  ;;  %p1988_p2 = por %p1987_p12, %p1986_p9 }
  0x7a   : > { %p1989_p4 = pnand %p1988_p2, %p1982_p7 }
  0x7c   : > { %1992 = shalt.err (!%p1989_p4)
}
  0x7d   : > { %s1993_s11 = scalar_lea.vmem %s2341_s9, 64  ;;  %s2139_s29 = smov [#allocation2]  }
  0x7e   : > { %p1994_p6 = scmp.ne.s32.totalorder %s2341_s9, %s1993_s11  ;;  %s1998_s15 = sshll.u32 %s2139_s29, 4  ;;  %s1999_s15 = int_to_ptr.vmem [resolvable:$false] %s1998_s15 }
  0x7f   : > { %s2000_s2 = scalar_lea.vmem %s1999_s15, 128  ;;  %p2001_p5 = scmp.lt.s32.totalorder %s2341_s9, %s1999_s15 }
  0x80   : > { %p1996_p11 = pnand %p1994_p6, %p1980_p3  ;;  %p2002_p10 = scmp.lt.s32.totalorder %s2000_s2, %s1993_s11 }
  0x82   : > { %p1997_p0 = pneg %p1996_p11  ;;  %p2003_p13 = por %p2002_p10, %p2001_p5 }
  0x84   : > { %p2004_p9 = pnand %p2003_p13, %p1997_p0 }
  0x86   : > { %2007 = shalt.err (!%p2004_p9)
}
  0x87   : > { %1732 = dma.hbm_to_vmem [thread:$0]  (!%p2345_p8), %s2339_s25, 64, %s2341_s9, %s247_s10  }
  0x88   : > { %s1459_s6 = sshll.u32 %s2128_s22, 7  ;;  %s269_s11 = scalar_lea.vmem [#allocation5], %s1458_s16 }
  0x89   : > { %s2381_s29 = scalar_lea.hbm %s2540_s1, %s1459_s6  ;;  %s277_s15 = sshll.u32 %s269_s11, 4  ;;  %s278_s15 = int_to_ptr.vmem [resolvable:$true] %s277_s15 }
  0x8a   : > { %s2563_s2 = sand.u32 1, %s2132_s23   ;;  %s2008_s3 = scalar_lea.hbm %s2381_s29, 128 }
  0x8b   : > { %s266_s0 = scalar_lea.sflag [#allocation6], %s2563_s2  ;;  %p2009_p7 = scmp.ne.s32.totalorder %s2381_s29, %s2008_s3 }
  0x8c   : > { %s2013_s10 = scalar_lea.hbm %s2540_s1, 256  ;;  %p2014_p4 = scmp.lt.u32.totalorder %s2381_s29, %s2540_s1 }
  0x8d   : > { %p2011_p12 = pnand %p2009_p7, %p1980_p3  ;;  %p2015_p6 = scmp.lt.u32.totalorder %s2013_s10, %s2008_s3 }
  0x8e   : > { %p2017_p0 = scmp.lt.u32.totalorder %s2008_s3, %s2381_s29 }
  0x8f   : > { %p2012_p2 = pneg %p2011_p12  ;;  %p2016_p11 = por %p2015_p6, %p2014_p4 }
  0x91   : > { %p2018_p5 = por %p2017_p0, %p2016_p11 }
  0x93   : > { %p2019_p10 = pnand %p2018_p5, %p2012_p2 }
  0x95   : > { %2022 = shalt.err (!%p2019_p10)
}
  0x96   : > { %s2023_s16 = scalar_lea.vmem %s278_s15, 128  ;;  %s2140_s17 = smov [#allocation5]  }
  0x97   : > { %p2024_p13 = scmp.ne.s32.totalorder %s278_s15, %s2023_s16  ;;  %s2028_s30 = sshll.u32 %s2140_s17, 4  ;;  %s2029_s30 = int_to_ptr.vmem [resolvable:$false] %s2028_s30 }
  0x98   : > { %s2030_s11 = scalar_lea.vmem %s2029_s30, 256  ;;  %p2031_p12 = scmp.lt.s32.totalorder %s278_s15, %s2029_s30 }
  0x99   : > { %p2026_p9 = pnand %p2024_p13, %p1980_p3  ;;  %p2032_p1 = scmp.lt.s32.totalorder %s2030_s11, %s2023_s16 }
  0x9b   : > { %p2027_p7 = pneg %p2026_p9  ;;  %p2033_p4 = por %p2032_p1, %p2031_p12 }
  0x9d   : > { %p2034_p6 = pnand %p2033_p4, %p2027_p7 }
  0x9f   : > { %2037 = shalt.err (!%p2034_p6)
}
  0xa0   : > { %1735 = dma.hbm_to_vmem [thread:$0]  (!%p2345_p8), %s2381_s29, 128, %s278_s15, %s266_s0  }
  0xa1   : > { %p2564_p2 = scmp.ne.s32.totalorder %s2554_s28, 0 }
  0xa2   : > { %s2409_s3 = sand.u32 (!%p2564_p2), 1, %s2116_s19   ;;  %p2565_p1 = scmp.ne.s32.totalorder (!%p2564_p2), %s2552_s26, 0 }
  0xa3   : > { %286 = sbr.rel (%p2564_p2) target bundleno = 633 (0x279), region = 40  ;;  %s1461_s2 = sshll.u32 (!%p2564_p2), %s2409_s3, 2 }
  0xa4   : > { %s289_s25 = scalar_lea.sflag (!%p2564_p2), [#allocation3], %s2409_s3  ;;  %s2413_s9 = scalar_lea.vmem (!%p2564_p2), [#allocation2], %s1461_s2 }
  0xaa   : > { %2091 = dma.done.wait (%p2565_p1), %s289_s25, 64  }
  0xab   : > { %2093 = vsyncadd (%p2565_p1), %s289_s25, 4294967232  ;;  %s297_s0 = sand.u32 1, %s2210_s24   ;;  %s1462_s28 = sshll.u32 %s2409_s3, 3 }
  0xac   : > { %s298_s7 = scalar_lea.sflag [#allocation6], %s297_s0  ;;  %s301_s29 = scalar_lea.vmem [#allocation5], %s1462_s28 }
  0xad   : > { %2095 = dma.done.wait (%p2565_p1), %s298_s7, 128  }
  0xae   : > { %2097 = vsyncadd (%p2565_p1), %s298_s7, 4294967168  ;;  %p2566_p8 = scmp.eq.s32.totalorder %s2210_s24, 0 }
  0xb0   : > { %2099 = dma.done.wait (%p2566_p8), [#allocation6], 128   ;;  %p2567_p3 = pmov %p2566_p8 }
  0xb2   : > { %2101 = vsyncadd (%p2567_p3), [#allocation6], 4294967168  ;;  %p2568_p11 = pmov %p2567_p3 }
  0xb3   : > { %p2569_p0 = pmov %p2567_p3 }
  0xb4   : > { %2103 = dma.done.wait (%p2568_p11), [#allocation9], 10240  }
  0xb5   : > { %2105 = vsyncadd (%p2569_p0), [#allocation9], 4294957056  ;;  %v2141_v0 = vmov 2   ;;  %v2142_v1 = vmov 0   ;;  %v346_v2 = vld [vmem:[%s301_s29] sm:$0xff]  ;;  %v1814_v3 = vld [vmem:[#allocation10 + $0x40] sm:$0xff]   ;;  %v347_v40 = vlaneseq }
  0xb6   : > { %1810 = vset.pattern.permute.xlu1 %v2141_v0  ;;  %1808 = vset.pattern.permute.xlu0 %v2142_v1  ;;  %v1815_v4 = vld [vmem:[#allocation10 + $0xc0] sm:$0xff]   ;;  %v2143_v7 = vmov 3   ;;  %v2144_v8 = vmov 1   ;;  %v1818_v9 = vld [vmem:[#allocation10 + $0x48] sm:$0xff]   ;;  %v1822_v13 = vld [vmem:[#allocation10 + $0x50] sm:$0xff]   ;;  %v2145_v14 = vmov 4  }
  0xb7   : > { %371 = vperm.xlu1 %1810, %v346_v2   ;;  %353 = vperm.xlu0 %1808, %v346_v2   ;;  %v1816_v5 = vld [vmem:[#allocation10] sm:$0xff]   ;;  %v1819_v10 = vld [vmem:[#allocation10 + $0xc8] sm:$0xff]   ;;  %v1823_v15 = vld [vmem:[#allocation10 + $0xd0] sm:$0xff]   ;;  %v2146_v39 = vmov 0.0   ;;  %v348_v41 = vand.u32 127, %v347_v40  ;;  %v2570_v49 = vmov 0 }
  0xb8   : > { %1555 = vmatprep.subr.bf16.mxu0 %v1814_v3  ;;  %1577 = vmatprep.subr.bf16.mxu1 %v1815_v4  ;;  %v1817_v6 = vld [vmem:[#allocation10 + $0x80] sm:$0xff]   ;;  %v1820_v11 = vld [vmem:[#allocation10 + $0x8] sm:$0xff]   ;;  %v1824_v16 = vld [vmem:[#allocation10 + $0x10] sm:$0xff]   ;;  %v2572_v50 = vmov 0  ;;  %s1552_s24 = sshll.u32 %s2124_s21, 7  ;;  %s344_s26 = scalar_lea.vmem [#allocation11], %s1462_s28 }
  0xb9   : > { %1556 = vmatpush3.bf16.msra.mxu0 %v1816_v5  ;;  %1578 = vmatpush3.bf16.msra.mxu1 %v1817_v6  ;;  %v1821_v12 = vld [vmem:[#allocation10 + $0x88] sm:$0xff]   ;;  %v1825_v17 = vld [vmem:[#allocation10 + $0x90] sm:$0xff]   ;;  %v1826_v18 = vld [vmem:[#allocation10 + $0x58] sm:$0xff]   ;;  %v349_v44 = vadd.s32 128, %v348_v41  ;;  %v350_v45 = vadd.s32 256, %v348_v41  ;;  %v351_v47 = vadd.s32 384, %v348_v41  ;;  %s2490_s6 = scalar_lea.hbm %s2544_s5, %s1552_s24 }
  0xba   : > { %1557 = vmatprep.subr.bf16.mxu0 %v1818_v9  ;;  %1579 = vmatprep.subr.bf16.mxu1 %v1819_v10  ;;  %v1827_v19 = vld [vmem:[#allocation10 + $0xd8] sm:$0xff]   ;;  %v1830_v22 = vld [vmem:[#allocation10 + $0x60] sm:$0xff]   ;;  %v1834_v26 = vld [vmem:[#allocation10 + $0x68] sm:$0xff]   ;;  %s1315_s15 = sshll.u32 %s344_s26, 4  ;;  %s1301_s16 = scalar_lea.sflag [#allocation4], %s2409_s3  ;;  %s2492_s15 = int_to_ptr.vmem [resolvable:$true] %s1315_s15 }
  0xbb   : > { %1811 = vset.pattern.permute.xlu1 %v2143_v7  ;;  %1809 = vset.pattern.permute.xlu0 %v2144_v8  ;;  %v1828_v20 = vld [vmem:[#allocation10 + $0x18] sm:$0xff]   ;;  %v1831_v23 = vld [vmem:[#allocation10 + $0xe0] sm:$0xff]   ;;  %v1835_v27 = vld [vmem:[#allocation10 + $0xe8] sm:$0xff]   ;;  %s2038_s21 = scalar_lea.vmem %s2492_s15, 128  ;;  %p2576_p10 = scmp.ne.s32.totalorder %s2560_s8, 0 }
  0xbc   : > { %382 = vperm.xlu1 %1811, %v346_v2   ;;  %360 = vperm.xlu0 %1809, %v346_v2   ;;  %v1829_v21 = vld [vmem:[#allocation10 + $0x98] sm:$0xff]   ;;  %v1832_v24 = vld [vmem:[#allocation10 + $0x20] sm:$0xff]   ;;  %v1836_v28 = vld [vmem:[#allocation10 + $0x28] sm:$0xff]   ;;  %p2039_p5 = scmp.ne.s32.totalorder %s2492_s15, %s2038_s21  ;;  %s2148_s17 = smov [#allocation11]  }
  0xbd   : > { %1558 = vmatpush3.bf16.msra.mxu0 %v1820_v11  ;;  %1580 = vmatpush3.bf16.msra.mxu1 %v1821_v12  ;;  %v1833_v25 = vld [vmem:[#allocation10 + $0xa0] sm:$0xff]   ;;  %v1837_v29 = vld [vmem:[#allocation10 + $0xa8] sm:$0xff]   ;;  %v1838_v30 = vld [vmem:[#allocation10 + $0x70] sm:$0xff]   ;;  %s2042_s30 = sshll.u32 %s2148_s17, 4  ;;  %s2043_s30 = int_to_ptr.vmem [resolvable:$false] %s2042_s30 }
  0xbe   : > { %1559 = vmatprep.subr.bf16.mxu0 %v1822_v13  ;;  %1581 = vmatprep.subr.bf16.mxu1 %v1823_v15  ;;  %v1839_v31 = vld [vmem:[#allocation10 + $0xf0] sm:$0xff]   ;;  %v1842_v34 = vld [vmem:[#allocation10 + $0x78] sm:$0xff]   ;;  %v1846_v38 = vld [vmem:[#allocation8 + $0x40] sm:$0xff]   ;;  %p2040_p13 = pnand %p2039_p5, %p2576_p10  ;;  %s2044_s11 = scalar_lea.vmem %s2043_s30, 256 }
  0xbf   : > { %v1840_v32 = vld [vmem:[#allocation10 + $0x30] sm:$0xff]   ;;  %v1843_v35 = vld [vmem:[#allocation10 + $0xf8] sm:$0xff]   ;;  %v1847_v57 = vld [vmem:[#allocation10 + $0x100] sm:$0xff]   ;;  %p2045_p7 = scmp.lt.s32.totalorder %s2492_s15, %s2043_s30  ;;  %p2046_p12 = scmp.lt.s32.totalorder %s2044_s11, %s2038_s21 }
  0xc0   : > { %1812 = vset.pattern.permute.xlu1 %v2145_v14  ;;  %1813 = vset.pattern.permute.xlu0 %v2145_v14  ;;  %v1841_v33 = vld [vmem:[#allocation10 + $0xb0] sm:$0xff]   ;;  %v1844_v36 = vld [vmem:[#allocation10 + $0x38] sm:$0xff]   ;;  %v1848_v61 = vld [vmem:[#allocation8] sm:$0xff]   ;;  %p2041_p9 = pneg %p2040_p13 }
  0xc1   : > { %393 = vperm.xlu1 %1812, %v346_v2   ;;  %1560 = vmatpush3.bf16.msra.mxu0 %v1824_v16  ;;  %v1845_v37 = vld [vmem:[#allocation10 + $0xb8] sm:$0xff]   ;;  %v1849_v62 = vld [vmem:[#allocation8 + $0x48] sm:$0xff]   ;;  %v1852_v1 = vld [vmem:[#allocation8 + $0x50] sm:$0xff]   ;;  %p2047_p4 = por %p2046_p12, %p2045_p7 }
  0xc2   : > { %1582 = vmatpush3.bf16.msra.mxu1 %v1825_v17  ;;  %1561 = vmatprep.subr.bf16.mxu0 %v1826_v18  ;;  %v1850_v63 = vld [vmem:[#allocation10 + $0x108] sm:$0xff]   ;;  %v1853_v2 = vld [vmem:[#allocation10 + $0x110] sm:$0xff]   ;;  %v1855_v4 = vld [vmem:[#allocation8 + $0x58] sm:$0xff]  }
  0xc3   : > { %1583 = vmatprep.subr.bf16.mxu1 %v1827_v19  ;;  %v1851_v0 = vld [vmem:[#allocation8 + $0x8] sm:$0xff]   ;;  %v1854_v3 = vld [vmem:[#allocation8 + $0x10] sm:$0xff]   ;;  %v1856_v5 = vld [vmem:[#allocation10 + $0x118] sm:$0xff]   ;;  %p2048_p6 = pnand %p2047_p4, %p2041_p9 }
  0xc4   : > { %v1857_v6 = vld [vmem:[#allocation8 + $0x18] sm:$0xff]   ;;  %v1858_v7 = vld [vmem:[#allocation8 + $0x60] sm:$0xff]   ;;  %v1861_v10 = vld [vmem:[#allocation8 + $0x68] sm:$0xff]  }
  0xc5   : > { %1562 = vmatpush3.bf16.msra.mxu0 %v1828_v20  ;;  %v1859_v8 = vld [vmem:[#allocation10 + $0x120] sm:$0xff]   ;;  %v1862_v11 = vld [vmem:[#allocation10 + $0x128] sm:$0xff]   ;;  %v1864_v13 = vld [vmem:[#allocation8 + $0x70] sm:$0xff]  }
  0xc6   : > { %1584 = vmatpush3.bf16.msra.mxu1 %v1829_v21  ;;  %1563 = vmatprep.subr.bf16.mxu0 %v1830_v22  ;;  %v1860_v9 = vld [vmem:[#allocation8 + $0x20] sm:$0xff]   ;;  %v1863_v12 = vld [vmem:[#allocation8 + $0x28] sm:$0xff]   ;;  %v1865_v14 = vld [vmem:[#allocation10 + $0x130] sm:$0xff]  }
  0xc7   : > { %1585 = vmatprep.subr.bf16.mxu1 %v1831_v23  ;;  %v1866_v15 = vld [vmem:[#allocation8 + $0x30] sm:$0xff]   ;;  %v1867_v16 = vld [vmem:[#allocation8 + $0x78] sm:$0xff]   ;;  %v1870_v18 = vld [vmem:[#allocation8 + $0xc0] sm:$0xff]  }
  0xc8   : > { %v1868_v17 = vld [vmem:[#allocation10 + $0x138] sm:$0xff]   ;;  %v415_v20 = vld [vmem:[%s2413_s9] sm:$0xf]  ;;  %v1873_v22 = vld [vmem:[#allocation8 + $0xc8] sm:$0xff]  }
  0xc9   : > { %1564 = vmatpush3.bf16.msra.mxu0 %v1832_v24  ;;  %v1869_v19 = vld [vmem:[#allocation8 + $0x38] sm:$0xff]   ;;  %v1871_v21 = vld [vmem:[#allocation8 + $0x80] sm:$0xff]   ;;  %v1874_v24 = vld [vmem:[#allocation8 + $0x88] sm:$0xff]  }
  0xca   : > { %1586 = vmatpush3.bf16.msra.mxu1 %v1833_v25  ;;  %1565 = vmatprep.subr.bf16.mxu0 %v1834_v26  ;;  %v1872_v23 = vld [vmem:[#allocation8 + $0x100] sm:$0xff]   ;;  %v1876_v25 = vld [vmem:[#allocation8 + $0xd0] sm:$0xff]   ;;  %v1875_v26 = vld [vmem:[#allocation8 + $0x108] sm:$0xff]  }
  0xcb   : > { %1587 = vmatprep.subr.bf16.mxu1 %v1835_v27  ;;  %v1877_v27 = vld [vmem:[#allocation8 + $0x90] sm:$0xff]  }
  0xcc   : > { %v1889_v40 = vld [vmem:[#allocation8 + $0xb0] sm:$0xff]  }
  0xcd   : > { %1566 = vmatpush3.bf16.msra.mxu0 %v1836_v28  ;;  %v1879_v28 = vld [vmem:[#allocation8 + $0xd8] sm:$0xff]  }
  0xce   : > { %1588 = vmatpush3.bf16.msra.mxu1 %v1837_v29  ;;  %1567 = vmatprep.subr.bf16.mxu0 %v1838_v30  ;;  %v1878_v29 = vld [vmem:[#allocation8 + $0x110] sm:$0xff]   ;;  %v1880_v30 = vld [vmem:[#allocation8 + $0x98] sm:$0xff]  }
  0xcf   : > { %1589 = vmatprep.subr.bf16.mxu1 %v1839_v31  ;;  %v1882_v31 = vld [vmem:[#allocation8 + $0xe0] sm:$0xff]  }
  0xd1   : > { %1568 = vmatpush3.bf16.msra.mxu0 %v1840_v32  ;;  %v1881_v32 = vld [vmem:[#allocation8 + $0x118] sm:$0xff]  }
  0xd2   : > { %1590 = vmatpush3.bf16.msra.mxu1 %v1841_v33  ;;  %1569 = vmatprep.subr.bf16.mxu0 %v1842_v34  ;;  %v1883_v33 = vld [vmem:[#allocation8 + $0xa0] sm:$0xff]   ;;  %v1885_v34 = vld [vmem:[#allocation8 + $0xe8] sm:$0xff]  }
  0xd3   : > { %1591 = vmatprep.subr.bf16.mxu1 %v1843_v35  ;;  %v1884_v35 = vld [vmem:[#allocation8 + $0x120] sm:$0xff]  }
  0xd5   : > { %1570 = vmatpush3.bf16.msra.mxu0 %v1844_v36  ;;  %v1886_v36 = vld [vmem:[#allocation8 + $0xa8] sm:$0xff]  }
  0xd6   : > { %1592 = vmatpush3.bf16.msra.mxu1 %v1845_v37  ;;  %1661 = vmatprep.subr.bf16.mxu0 %v2146_v39  ;;  %v1888_v37 = vld [vmem:[#allocation8 + $0xf0] sm:$0xff]  }
  0xd7   : > { %1608 = vmatprep.subr.bf16.mxu1 %v1846_v38  ;;  %v1887_v38 = vld [vmem:[#allocation8 + $0x128] sm:$0xff]  }
 0x136   : > { %v372_v42 = vpop.permute.xlu1 %371  ;;  %v354_v43 = vpop.permute.xlu0 %353 }
 0x137   : > { %vm355_vm0 = vcmp.eq.s32.totalorder %v348_v41, %v354_v43  ;;  %vm356_vm3 = vcmp.eq.s32.totalorder %v349_v44, %v354_v43  ;;  %vm357_vm7 = vcmp.eq.s32.totalorder %v350_v45, %v354_v43  ;;  %vm358_vm9 = vcmp.eq.s32.totalorder %v351_v47, %v354_v43  ;;  %v1892_v43 = vld [vmem:[#allocation8 + $0xb8] sm:$0xff]  }
 0x138   : > { %vm373_vm11 = vcmp.eq.s32.totalorder %v348_v41, %v372_v42  ;;  %vm375_vm13 = vcmp.eq.s32.totalorder %v350_v45, %v372_v42 }
 0x13b   : > { %v383_v46 = vpop.permute.xlu1 %382  ;;  %v361_v48 = vpop.permute.xlu0 %360 }
 0x13c   : > { %vm362_vm1 = vcmp.eq.s32.totalorder %v348_v41, %v361_v48  ;;  %vm363_vm2 = vcmp.eq.s32.totalorder %v349_v44, %v361_v48  ;;  %vm364_vm4 = vcmp.eq.s32.totalorder %v350_v45, %v361_v48  ;;  %vm365_vm5 = vcmp.eq.s32.totalorder %v351_v47, %v361_v48 }
 0x13d   : > { %vm366_vm6 = vmor %vm355_vm0, %vm362_vm1  ;;  %vm384_vm15 = vcmp.eq.s32.totalorder %v348_v41, %v383_v46 }
 0x13e   : > { %vm2436_vm8 = vmor %vm356_vm3, %vm363_vm2  ;;  %vm386_vm2 = vcmp.eq.s32.totalorder %v350_v45, %v383_v46 }
 0x13f   : > { %v2571_v49 = vsel %vm2436_vm8, 4294967295, %v2570_v49  ;;  %vm368_vm10 = vmor %vm357_vm7, %vm364_vm4 }
 0x140   : > { %vm2440_vm12 = vmor %vm358_vm9, %vm365_vm5  ;;  %v394_v51 = vpop.permute.xlu1 %393 }
 0x141   : > { %v2573_v50 = vsel %vm2440_vm12, 4294967295, %v2572_v50  ;;  %vm377_vm14 = vmor %vm366_vm6, %vm373_vm11  ;;  %vm395_vm1 = vcmp.eq.s32.totalorder %v348_v41, %v394_v51  ;;  %vm397_vm8 = vcmp.eq.s32.totalorder %v350_v45, %v394_v51  ;;  %vm396_vm5 = vcmp.eq.s32.totalorder %v349_v44, %v394_v51  ;;  %v1891_v41 = vld [vmem:[#allocation8 + $0xf8] sm:$0xff]  }
 0x142   : > { %vm379_vm0 = vmor %vm368_vm10, %vm375_vm13  ;;  %vm374_vm12 = vcmp.eq.s32.totalorder %v349_v44, %v372_v42  ;;  %vm2574_vm6 = vnez %v2571_v49  ;;  %vm385_vm10 = vcmp.eq.s32.totalorder %v349_v44, %v383_v46  ;;  %v1893_v44 = vld [vmem:[#allocation8 + $0x138] sm:$0xff]  }
 0x143   : > { %vm388_vm3 = vmor %vm377_vm14, %vm384_vm15  ;;  %vm398_vm14 = vcmp.eq.s32.totalorder %v351_v47, %v394_v51 }
 0x144   : > { %vm390_vm4 = vmor %vm379_vm0, %vm386_vm2  ;;  %vm376_vm0 = vcmp.eq.s32.totalorder %v351_v47, %v372_v42  ;;  %vm2575_vm2 = vnez %v2573_v50  ;;  %v1890_v42 = vld [vmem:[#allocation8 + $0x130] sm:$0xff]  }
 0x145   : > { %vm399_vm7 = vmor %vm388_vm3, %vm395_vm1  ;;  %vm387_vm3 = vcmp.eq.s32.totalorder %v351_v47, %v383_v46 }
 0x146   : > { %vm401_vm9 = vmor %vm390_vm4, %vm397_vm8  ;;  %v1467_v52 = vsel %vm399_vm7, 1.0, %v2146_v39  ;;  %vm2147_vm4 = vmmov 0   ;;  %vm1298_vm7 = vcmask 261120  }
 0x147   : > { %vm378_vm11 = vmor %vm2574_vm6, %vm374_vm12  ;;  %v2450_v54 = vpack.c.bf16 %v1467_v52, %v1467_v52  ;;  %v1469_v55 = vsel %vm401_vm9, 1.0, %v2146_v39 }
 0x148   : > { %vm389_vm13 = vmor %vm378_vm11, %vm385_vm10  ;;  %v2454_v59 = vpack.c.bf16 %v1469_v55, %v1469_v55 }
 0x149   : > { %vm400_vm15 = vmor %vm389_vm13, %vm396_vm5 }
 0x14a   : > { %v1468_v53 = vsel %vm400_vm15, 1.0, %v2146_v39  ;;  %vm380_vm1 = vmor %vm2575_vm2, %vm376_vm0 }
 0x14b   : > { %v412_v56 = vpack.c.bf16 %v1468_v53, %v1468_v53  ;;  %vm391_vm8 = vmor %vm380_vm1, %vm387_vm3 }
 0x14c   : > { %vm402_vm12 = vmor %vm391_vm8, %vm398_vm14 }
 0x14d   : > { %848 = vmatprep.mubr.bf16.mxu0 %v412_v56  ;;  %v1470_v58 = vsel %vm402_vm12, 1.0, %v2146_v39 }
 0x14e   : > { %v2456_v60 = vpack.c.bf16 %v1470_v58, %v1470_v58  ;;  %849 = vmatmul.mubr.bf16.vlgmr.msra.gmra.mrb[0].mxu0 %v2450_v54 }
 0x14f   : > { %1662 = vmatpush3.bf16.msra.mxu0 %v1847_v57  ;;  %1677 = vmatprep.mubr.msk.bf16.mxu0 %vm2147_vm4, %v2146_v39 }
 0x150   : > { %888 = vmatprep.mubr.bf16.mxu1 %v2456_v60  ;;  %1663 = vmatprep.subr.bf16.mxu0 %v2146_v39 }
 0x151   : > { %889 = vmatmul.mubr.bf16.vlgmr.msra.gmra.mrb[0].mxu1 %v2454_v59 }
 0x152   : > { %1609 = vmatpush3.bf16.msra.mxu1 %v1848_v61  ;;  %1208 = vmatprep.mubr.bf16.mxu1 %v412_v56 }
 0x153   : > { %1610 = vmatprep.subr.bf16.mxu1 %v1849_v62  ;;  %1664 = vmatpush3.bf16.msra.mxu0 %v1850_v63 }
 0x154   : > { %1665 = vmatprep.subr.bf16.mxu0 %v2146_v39 }
 0x156   : > { %1611 = vmatpush3.bf16.msra.mxu1 %v1851_v0 }
 0x157   : > { %1612 = vmatprep.subr.bf16.mxu1 %v1852_v1  ;;  %1666 = vmatpush3.bf16.msra.mxu0 %v1853_v2 }
 0x158   : > { %1667 = vmatprep.subr.bf16.mxu0 %v2146_v39 }
 0x15a   : > { %1613 = vmatpush3.bf16.msra.mxu1 %v1854_v3 }
 0x15b   : > { %1614 = vmatprep.subr.bf16.mxu1 %v1855_v4  ;;  %1668 = vmatpush3.bf16.msra.mxu0 %v1856_v5 }
 0x15c   : > { %1669 = vmatprep.subr.bf16.mxu0 %v2146_v39 }
 0x15e   : > { %1615 = vmatpush3.bf16.msra.mxu1 %v1857_v6 }
 0x15f   : > { %1616 = vmatprep.subr.bf16.mxu1 %v1858_v7  ;;  %1670 = vmatpush3.bf16.msra.mxu0 %v1859_v8 }
 0x160   : > { %1671 = vmatprep.subr.bf16.mxu0 %v2146_v39 }
 0x162   : > { %1617 = vmatpush3.bf16.msra.mxu1 %v1860_v9 }
 0x163   : > { %1618 = vmatprep.subr.bf16.mxu1 %v1861_v10  ;;  %1672 = vmatpush3.bf16.msra.mxu0 %v1862_v11  ;;  %v1296_v10 = vld [vmem:[#allocation7] sm:$0xff] }
 0x164   : > { %1673 = vmatprep.subr.bf16.mxu0 %v2146_v39 }
 0x166   : > { %1619 = vmatpush3.bf16.msra.mxu1 %v1863_v12 }
 0x167   : > { %1620 = vmatprep.subr.bf16.mxu1 %v1864_v13  ;;  %1674 = vmatpush3.bf16.msra.mxu0 %v1865_v14 }
 0x168   : > { %1675 = vmatprep.subr.bf16.mxu0 %v2146_v39 }
 0x16a   : > { %1621 = vmatpush3.bf16.msra.mxu1 %v1866_v15 }
 0x16b   : > { %1622 = vmatprep.subr.bf16.mxu1 %v1867_v16  ;;  %1676 = vmatpush3.bf16.msra.mxu0 %v1868_v17 }
 0x16c   : > { %1630 = vmatprep.subr.bf16.mxu0 %v1870_v18 }
 0x16e   : > { %1623 = vmatpush3.bf16.msra.mxu1 %v1869_v19  ;;  %1678 = vmatmul.mubr.bf16.vlgmr.msra.gmra.mrb[4].mxu0 %v415_v20 }
 0x16f   : > { %1631 = vmatpush3.bf16.msra.mxu0 %v1871_v21  ;;  %1248 = vmatprep.mubr.bf16.mxu0 %v2456_v60 }
 0x170   : > { %1681 = vmatprep.subr.bf16.mxu1 %v2146_v39  ;;  %1632 = vmatprep.subr.bf16.mxu0 %v1873_v22 }
 0x171   : > { %1209 = vmatmul.mubr.bf16.vlgmr.msra.gmra.mrb[4].mxu1 %v2450_v54 }
 0x172   : > { %1682 = vmatpush3.bf16.msra.mxu1 %v1872_v23  ;;  %1697 = vmatprep.mubr.msk.bf16.mxu1 %vm2147_vm4, %v2146_v39 }
 0x173   : > { %1633 = vmatpush3.bf16.msra.mxu0 %v1874_v24  ;;  %1683 = vmatprep.subr.bf16.mxu1 %v2146_v39 }
 0x174   : > { %1634 = vmatprep.subr.bf16.mxu0 %v1876_v25 }
 0x176   : > { %1684 = vmatpush3.bf16.msra.mxu1 %v1875_v26 }
 0x177   : > { %1635 = vmatpush3.bf16.msra.mxu0 %v1877_v27  ;;  %1685 = vmatprep.subr.bf16.mxu1 %v2146_v39 }
 0x178   : > { %1636 = vmatprep.subr.bf16.mxu0 %v1879_v28 }
 0x17a   : > { %1686 = vmatpush3.bf16.msra.mxu1 %v1878_v29 }
 0x17b   : > { %1637 = vmatpush3.bf16.msra.mxu0 %v1880_v30  ;;  %1687 = vmatprep.subr.bf16.mxu1 %v2146_v39 }
 0x17c   : > { %1638 = vmatprep.subr.bf16.mxu0 %v1882_v31 }
 0x17e   : > { %1688 = vmatpush3.bf16.msra.mxu1 %v1881_v32 }
 0x17f   : > { %1639 = vmatpush3.bf16.msra.mxu0 %v1883_v33  ;;  %1689 = vmatprep.subr.bf16.mxu1 %v2146_v39 }
 0x180   : > { %1640 = vmatprep.subr.bf16.mxu0 %v1885_v34 }
 0x182   : > { %1690 = vmatpush3.bf16.msra.mxu1 %v1884_v35 }
 0x183   : > { %1641 = vmatpush3.bf16.msra.mxu0 %v1886_v36  ;;  %1691 = vmatprep.subr.bf16.mxu1 %v2146_v39 }
 0x184   : > { %1642 = vmatprep.subr.bf16.mxu0 %v1888_v37 }
 0x186   : > { %1692 = vmatpush3.bf16.msra.mxu1 %v1887_v38 }
 0x187   : > { %1643 = vmatpush3.bf16.msra.mxu0 %v1889_v40  ;;  %1693 = vmatprep.subr.bf16.mxu1 %v2146_v39 }
 0x188   : > { %1644 = vmatprep.subr.bf16.mxu0 %v1891_v41 }
 0x18a   : > { %1694 = vmatpush3.bf16.msra.mxu1 %v1890_v42 }
 0x18b   : > { %1645 = vmatpush3.bf16.msra.mxu0 %v1892_v43  ;;  %1695 = vmatprep.subr.bf16.mxu1 %v2146_v39 }
 0x18e   : > { %1696 = vmatpush3.bf16.msra.mxu1 %v1893_v44  ;;  %1249 = vmatmul.mubr.bf16.vlgmr.msra.gmra.mrb[8].mxu0 %v2454_v59 }
 0x191   : > { %1698 = vmatmul.mubr.bf16.vlgmr.msra.gmra.mrb[8].mxu1 %v415_v20 }
 0x221   : > { %v1571_v45 = vpop.f32.mrb[0].mxu0 }
 0x222   : > { %v1572_v46 = vpop.f32.mrb[1].mxu0 }
 0x223   : > { %v1573_v47 = vadd.f32 %v1572_v46, %v1571_v45  ;;  %v1574_v48 = vpop.f32.mrb[2].mxu0 }
 0x224   : > { %v1593_v49 = vpop.f32.mrb[0].mxu1  ;;  %v1575_v50 = vpop.f32.mrb[3].mxu0 }
 0x225   : > { %v1594_v51 = vpop.f32.mrb[1].mxu1 }
 0x226   : > { %v1595_v52 = vadd.f32 %v1594_v51, %v1593_v49  ;;  %v1596_v53 = vpop.f32.mrb[2].mxu1 }
 0x227   : > { %v1597_v54 = vpop.f32.mrb[3].mxu1 }
 0x228   : > { %v891_v55 = vadd.f32 %v1595_v52, %v1573_v47 }
 0x241   : > { %v930_v56 = vpop.f32.mrb[4].mxu0 }
 0x242   : > { %v931_v57 = vadd.f32 %v930_v56, %v891_v55  ;;  %v1679_v58 = vpop.f32.mrb[5].mxu0 }
 0x243   : > { %v933_v60 = vpop.f32.mrb[6].mxu0 }
 0x244   : > { %v1624_v39 = vpop.f32.mrb[4].mxu1  ;;  %v1680_v61 = vpop.f32.mrb[7].mxu0 }
 0x245   : > { %v1625_v59 = vpop.f32.mrb[5].mxu1 }
 0x246   : > { %v1626_v62 = vadd.f32 %v1625_v59, %v1624_v39  ;;  %v1627_v63 = vpop.f32.mrb[6].mxu1 }
 0x247   : > { %v1628_v0 = vpop.f32.mrb[7].mxu1 }
 0x248   : > { %v1211_v1 = vadd.f32 %v1626_v62, %v931_v57 }
 0x261   : > { %v1646_v2 = vpop.f32.mrb[8].mxu0 }
 0x262   : > { %v1647_v3 = vpop.f32.mrb[9].mxu0 }
 0x263   : > { %v1648_v4 = vadd.f32 %v1647_v3, %v1646_v2  ;;  %v1649_v5 = vpop.f32.mrb[10].mxu0 }
 0x264   : > { %v1290_v6 = vpop.f32.mrb[8].mxu1  ;;  %v1650_v7 = vpop.f32.mrb[11].mxu0 }
 0x265   : > { %v1251_v8 = vadd.f32 %v1648_v4, %v1211_v1  ;;  %v1699_v9 = vpop.f32.mrb[9].mxu1 }
 0x266   : > { %v1293_v11 = vpop.f32.mrb[10].mxu1 }
 0x267   : > { %v1291_v12 = vadd.f32 %v1290_v6, %v1251_v8  ;;  %v1700_v13 = vpop.f32.mrb[11].mxu1 }
 0x269   : > { %v1297_v14 = vadd.f32 %v1296_v10, %v1291_v12 }
 0x26b   : > { %1299 = vst.msk [vmem:[%s344_s26] sm:$0xff] %vm1298_vm7, %v1297_v14 }
 0x26c   : > { %2051 = shalt.err (!%p2048_p6)
}
 0x26d   : > { %s2052_s3 = scalar_lea.hbm %s2490_s6, 128  ;;  %s2056_s9 = scalar_lea.hbm %s2544_s5, 256 }
 0x26e   : > { %p2053_p2 = scmp.ne.s32.totalorder %s2490_s6, %s2052_s3  ;;  %p2057_p3 = scmp.lt.u32.totalorder %s2490_s6, %s2544_s5 }
 0x26f   : > { %p2058_p11 = scmp.lt.u32.totalorder %s2056_s9, %s2052_s3  ;;  %p2060_p5 = scmp.lt.u32.totalorder %s2052_s3, %s2490_s6 }
 0x270   : > { %p2054_p1 = pnand %p2053_p2, %p2576_p10 }
 0x271   : > { %p2059_p0 = por %p2058_p11, %p2057_p3 }
 0x272   : > { %p2055_p8 = pneg %p2054_p1 }
 0x273   : > { %p2061_p13 = por %p2060_p5, %p2059_p0 }
 0x275   : > { %p2062_p9 = pnand %p2061_p13, %p2055_p8 }
 0x277   : > { %2065 = shalt.err (!%p2062_p9)
}
 0x278   : > { %1717 = dma.vmem_to_hbm [thread:$0]  (%p2576_p10), %s2492_s15, 128, %s2490_s6, %s1301_s16  }
 0x279 PF: > { %s1327_s7 = sand.u32 1, %s2112_s18   ;;  %p2577_p7 = scmp.ne.s32.totalorder %s2553_s27, 0 }
 0x27a   : > { %p2578_p12 = scmp.ge.s32.totalorder %s2132_s23, 2  ;;  %s1328_s29 = scalar_lea.sflag [#allocation4], %s1327_s7 }
 0x27c   : > { %p1737_p4 = pnand %p2578_p12, %p2577_p7 }
 0x27e   : > { %2107 = dma.done.wait (!%p1737_p4), %s1328_s29, 128  }
 0x27f   : > { %2109 = vsyncadd (!%p1737_p4), %s1328_s29, 4294967168  ;;  %s25_s23 = sadd.s32 1, %s2132_s23   ;;  %s2579_s18 = smov %s2116_s19 }
 0x280   : > { %p22_p6 = scmp.ge.s32.totalorder %s25_s23, 4   ;;  %s2580_s19 = smov %s2120_s20 }
 0x281   : > { %s2581_s20 = smov %s2334_s14  ;;  %s2582_s21 = smov %s2128_s22 }
 0x282   : > { %s2583_s22 = smov %s2585_s12  ;;  %24 = sbr.rel (!%p22_p6) target bundleno = 13 (0xd), region = 111 }
 0x289   :  { %1333 = vsyncpa [#allocation3], 1 }
 0x28a   :  { %1335 = vsyncpa [#allocation3 + $0x1], 1 }
 0x28b   :  { %1336 = vsyncpa [#allocation6], 1 }
 0x28c   :  { %1338 = vsyncpa [#allocation6 + $0x1], 1 }
 0x28d   :  { %1339 = vsyncpa [#allocation9], 1 }
 0x28e   :  { %1340 = vsyncpa [#allocation4], 1 }
 0x28f   :  { %1342 = vsyncpa [#allocation4 + $0x1], 1 }

// kernel: tpu_custom_call.1
= control target key start
LH: loop header
LB: loop body
LE: loop exit
PB: predicated region body
PF: predicated region fallthrough
CT: control target
= control target key end

     0   :  { %s2539_s0 = inlined_call_operand.hbm [shape: bf16[2,8,128], index: 0, kind: input, shape index: {}]   ;;  %s2540_s1 = inlined_call_operand.hbm [shape: s32[2,8,5], index: 1, kind: input, shape index: {}]   ;;  %s2541_s2 = inlined_call_operand.hbm [shape: f32[8,32], index: 2, kind: input, shape index: {}]   ;;  %s2542_s3 = inlined_call_operand.hbm [shape: bf16[640,32], index: 3, kind: input, shape index: {}]   ;;  %s2543_s4 = inlined_call_operand.hbm [shape: bf16[640,32], index: 4, kind: input, shape index: {}]   ;;  %s2544_s5 = inlined_call_operand.hbm [shape: f32[2,8,32], index: 5, kind: output, shape index: {}]  }
   0x1   :  { %2549 = sst [smem:[#allocation17_spill]] %s2539_s0 }
   0x2   :  { %2550 = sst [smem:[#allocation18_spill]] %s2541_s2 }
   0x3   :  { %2551 = sst [smem:[#allocation19_spill]] %s2542_s3 }
   0x4   :  { %10 = vsyncpa [#allocation3], 0 }
   0x5   :  { %12 = vsyncpa [#allocation3 + $0x1], 0 }
   0x6   :  { %13 = vsyncpa [#allocation6], 0 }
   0x7   :  { %15 = vsyncpa [#allocation6 + $0x1], 0 }
   0x8   :  { %16 = vsyncpa [#allocation9], 0 }
   0x9   :  { %17 = vsyncpa [#allocation4], 0 }
   0xa   :  { %19 = vsyncpa [#allocation4 + $0x1], 0  ;;  %s2179_s18 = smov 0   ;;  %s2181_s19 = smov 0  }
   0xb   :  { %s2183_s20 = smov 0   ;;  %s2185_s21 = smov 0  }
   0xc   :  { %s2187_s22 = smov 0   ;;  %s2189_s23 = smov 0  }
   0xd LB: > { %s2210_s24 = sadd.s32 4294967295, %s2132_s23   ;;  %s1450_s25 = sadd.s32 4294967294, %s2132_s23   ;;  %s2132_s23 = sphi %s2189_s23, %s25_s23   ;;  %s2128_s22 = sphi %s2187_s22, %s2583_s22   ;;  %s2124_s21 = sphi %s2185_s21, %s2582_s21   ;;  %s2120_s20 = sphi %s2183_s20, %s2581_s20   ;;  %s2116_s19 = sphi %s2181_s19, %s2580_s19   ;;  %s2112_s18 = sphi %s2179_s18, %s2579_s18  }
   0xe   : > { %p59_p0 = scmp.ne.s32.totalorder %s2116_s19, %s2112_s18  ;;  %p2545_p1 = scmp.eq.s32.totalorder %s2210_s24, 0 }
   0xf   : > { %p187_p3 = scmp.eq.s32.totalorder %s1450_s25, 1  ;;  %p1451_p5 = scmp.ge.s32.totalorder %s2132_s23, 1 }
  0x10   : > { %p2219_p4 = por %p2545_p1, %p59_p0  ;;  %p194_p7 = scmp.lt.s32.totalorder %s2132_s23, 3 }
  0x11   : > { %p2224_p6 = por %p187_p3, %p59_p0  ;;  %s2134_s29 = smov [#allocation7]  }
  0x12   : > { %s2552_s26 = scalar_select %p2219_p4, 1, 0 }
  0x13   : > { %s2553_s27 = scalar_select %p2224_p6, 1, 0 }
  0x14   : > { %p2229_p8 = pnand %p1451_p5, %p194_p7  ;;  %s209_s30 = sshll.u32 %s2134_s29, 4  ;;  %s210_s30 = int_to_ptr.vmem [resolvable:$true] %s209_s30 }
  0x15   : > { %s2135_s6 = smov [#allocation8]   ;;  %s2136_s9 = smov [#allocation10]  }
  0x16   : > { %s2554_s28 = scalar_select %p2229_p8, 1, 0 }
  0x17   : > { %p1719_p10 = pneg %p2229_p8  ;;  %s219_s7 = sshll.u32 %s2135_s6, 4  ;;  %s2242_s7 = int_to_ptr.vmem [resolvable:$true] %s219_s7 }
  0x18   : > { %s2244_s10 = sshll.u32 %s2136_s9, 4  ;;  %s2556_s2 = sld [smem:[#allocation18_spill]]  ;;  %s233_s10 = int_to_ptr.vmem [resolvable:$true] %s2244_s10 }
  0x19   : > { %p2238_p11 = pnand %p1719_p10, %p2545_p1 }
  0x1b   : > { %p2254_p13 = pneg %p2238_p11 }
  0x1e   : > { %s1894_s13 = scalar_lea.hbm %s2556_s2, 128 }
  0x1f   : > { %p1895_p12 = scmp.ne.s32.totalorder %s2556_s2, %s1894_s13  ;;  %p1901_p5 = scmp.lt.u32.totalorder %s1894_s13, %s2556_s2 }
  0x21   : > { %p1897_p0 = pnand %p2254_p13, %p1895_p12 }
  0x23   : > { %p1898_p3 = pneg %p1897_p0 }
  0x25   : > { %p1903_p7 = pnand %p1901_p5, %p1898_p3 }
  0x27   : > { %1906 = shalt.err (!%p1903_p7)
}
  0x28   : > { %s1907_s29 = scalar_lea.vmem %s210_s30, 128  ;;  %p1915_p2 = scmp.lt.s32.totalorder %s210_s30, %s210_s30 }
  0x29   : > { %p1908_p10 = scmp.ne.s32.totalorder %s210_s30, %s1907_s29  ;;  %p1916_p6 = scmp.lt.s32.totalorder %s1907_s29, %s1907_s29 }
  0x2b   : > { %p1910_p9 = pnand %p1908_p10, %p2254_p13  ;;  %p1917_p4 = por %p1916_p6, %p1915_p2 }
  0x2d   : > { %p1911_p1 = pneg %p1910_p9 }
  0x2f   : > { %p1918_p8 = pnand %p1917_p4, %p1911_p1 }
  0x31   : > { %1921 = shalt.err (!%p1918_p8)
}
  0x32   : > { %1722 = dma.hbm_to_vmem [thread:$0]  (!%p2238_p11), %s2556_s2, 128, %s210_s30, [#allocation6]  }
  0x33   : > { %s2558_s3 = sld [smem:[#allocation19_spill]] }
  0x39   : > { %s1922_s13 = scalar_lea.hbm %s2558_s3, 5120 }
  0x3a   : > { %p1923_p9 = scmp.ne.s32.totalorder %s2558_s3, %s1922_s13  ;;  %p1929_p1 = scmp.lt.u32.totalorder %s1922_s13, %s2558_s3 }
  0x3c   : > { %p1925_p12 = pnand %p1923_p9, %p2254_p13 }
  0x3e   : > { %p1926_p2 = pneg %p1925_p12 }
  0x40   : > { %p1931_p4 = pnand %p1929_p1, %p1926_p2 }
  0x42   : > { %1934 = shalt.err (!%p1931_p4)
}
  0x43   : > { %s1935_s30 = scalar_lea.vmem %s2242_s7, 5120  ;;  %p1943_p3 = scmp.lt.s32.totalorder %s2242_s7, %s2242_s7 }
  0x44   : > { %p1936_p6 = scmp.ne.s32.totalorder %s2242_s7, %s1935_s30  ;;  %p1944_p5 = scmp.lt.s32.totalorder %s1935_s30, %s1935_s30 }
  0x46   : > { %p1938_p8 = pnand %p1936_p6, %p2254_p13  ;;  %p1945_p7 = por %p1944_p5, %p1943_p3 }
  0x48   : > { %p1939_p0 = pneg %p1938_p8 }
  0x4a   : > { %p1946_p10 = pnand %p1945_p7, %p1939_p0 }
  0x4c   : > { %1949 = shalt.err (!%p1946_p10)
}
  0x4d   : > { %s2137_s29 = smov 64   ;;  %s2138_s6 = smov 4  }
  0x4e   : > { %1725 = dma.hbm_to_vmem [thread:$0]  (!%p2238_p11), %s2558_s3, 5120, %s2242_s7, [#allocation9], %s2137_s29, %s2137_s29, %s2138_s6  }
  0x4f   : > { %s1950_s14 = scalar_lea.hbm %s2543_s4, 5120 }
  0x50   : > { %p1951_p9 = scmp.ne.s32.totalorder %s2543_s4, %s1950_s14  ;;  %p1957_p1 = scmp.lt.u32.totalorder %s1950_s14, %s2543_s4 }
  0x52   : > { %p1953_p12 = pnand %p1951_p9, %p2254_p13 }
  0x54   : > { %p1954_p2 = pneg %p1953_p12 }
  0x56   : > { %p1959_p4 = pnand %p1957_p1, %p1954_p2 }
  0x58   : > { %1962 = shalt.err (!%p1959_p4)
}
  0x59   : > { %s1963_s9 = scalar_lea.vmem %s233_s10, 5120  ;;  %p1971_p3 = scmp.lt.s32.totalorder %s233_s10, %s233_s10 }
  0x5a   : > { %p1964_p6 = scmp.ne.s32.totalorder %s233_s10, %s1963_s9  ;;  %p1972_p5 = scmp.lt.s32.totalorder %s1963_s9, %s1963_s9 }
  0x5c   : > { %p1966_p8 = pnand %p1964_p6, %p2254_p13  ;;  %p1973_p7 = por %p1972_p5, %p1971_p3 }
  0x5e   : > { %p1967_p0 = pneg %p1966_p8 }
  0x60   : > { %p1974_p10 = pnand %p1973_p7, %p1967_p0 }
  0x62   : > { %1977 = shalt.err (!%p1974_p10)
}
  0x63   : > { %1728 = dma.hbm_to_vmem [thread:$0]  (!%p2238_p11), %s2543_s4, 5120, %s233_s10, [#allocation9], %s2137_s29, %s2137_s29, %s2138_s6  }
  0x64   : > { %s46_s16 = sadd.s32 1, %s2120_s20  ;;  %s34_s12 = sadd.s32 1, %s2128_s22 }
  0x65   : > { %p53_p13 = scmp.ne.s32.totalorder %s2120_s20, %s2116_s19  ;;  %p35_p9 = scmp.ge.s32.totalorder %s34_s12, 2 }
  0x66   : > { %p54_p12 = scmp.eq.s32.totalorder %s2132_s23, 0  ;;  %p2559_p2 = scmp.eq.s32.totalorder %s2210_s24, 1 }
  0x67   : > { %p1743_p4 = scmp.lt.s32.totalorder %s2132_s23, 2  ;;  %s2585_s12 = smov (%p35_p9, %s34_s12), 0 }
  0x68   : > { %p2319_p1 = por %p2559_p2, %p53_p13  ;;  %p55_p6 = por %p54_p12, %p53_p13 }
  0x69   : > { %s2327_s13 = sand.u32 1, %s2120_s20   ;;  %s41_s10 = ssub.s32 %s2128_s22, %s2585_s12 }
  0x6a   : > { %s2560_s8 = scalar_select %p2319_p1, 1, 0 }
  0x6b   : > { %p44_p11 = scmp.eq.s32.totalorder %s41_s10, 0  ;;  %s1456_s29 = sshll.u32 %s2327_s13, 2 }
  0x6c   : > { %s1457_s6 = sshll.u32 %s2128_s22, 6  ;;  %s2561_s0 = sld [smem:[#allocation17_spill]] }
  0x6d   : > { %s2334_s14 = scalar_select %p44_p11, %s2120_s20, %s46_s16  }
  0x6e   : > { %s250_s30 = scalar_lea.vmem [#allocation2], %s1456_s29  ;;  %p2345_p8 = pnand %p1743_p4, %p55_p6 }
  0x6f   : > { %s258_s9 = sshll.u32 %s250_s30, 4  ;;  %s1458_s16 = sshll.u32 %s2327_s13, 3  ;;  %s2341_s9 = int_to_ptr.vmem [resolvable:$true] %s258_s9 }
  0x70   : > { %s247_s10 = scalar_lea.sflag [#allocation3], %s2327_s13  ;;  %p1980_p3 = pneg %p2345_p8 }
  0x72   : > { %s2339_s25 = scalar_lea.hbm %s2561_s0, %s1457_s6  ;;  %s1983_s17 = scalar_lea.hbm %s2561_s0, 128 }
  0x73   : > { %s1978_s6 = scalar_lea.hbm %s2339_s25, 64  ;;  %p1984_p10 = scmp.lt.u32.totalorder %s2339_s25, %s2561_s0 }
  0x74   : > { %p1979_p0 = scmp.ne.s32.totalorder %s2339_s25, %s1978_s6  ;;  %p1985_p13 = scmp.lt.u32.totalorder %s1983_s17, %s1978_s6 }
  0x75   : > { %p1987_p12 = scmp.lt.u32.totalorder %s1978_s6, %s2339_s25 }
  0x76   : > { %p1981_p5 = pnand %p1980_p3, %p1979_p0  ;;  %p1986_p9 = por %p1985_p13, %p1984_p10 }
  0x78   : > { %p1982_p7 = pneg %p1981_p5  ;;  %p1988_p2 = por %p1987_p12, %p1986_p9 }
  0x7a   : > { %p1989_p4 = pnand %p1988_p2, %p1982_p7 }
  0x7c   : > { %1992 = shalt.err (!%p1989_p4)
}
  0x7d   : > { %s1993_s11 = scalar_lea.vmem %s2341_s9, 64  ;;  %s2139_s29 = smov [#allocation2]  }
  0x7e   : > { %p1994_p6 = scmp.ne.s32.totalorder %s2341_s9, %s1993_s11  ;;  %s1998_s15 = sshll.u32 %s2139_s29, 4  ;;  %s1999_s15 = int_to_ptr.vmem [resolvable:$false] %s1998_s15 }
  0x7f   : > { %s2000_s2 = scalar_lea.vmem %s1999_s15, 128  ;;  %p2001_p5 = scmp.lt.s32.totalorder %s2341_s9, %s1999_s15 }
  0x80   : > { %p1996_p11 = pnand %p1994_p6, %p1980_p3  ;;  %p2002_p10 = scmp.lt.s32.totalorder %s2000_s2, %s1993_s11 }
  0x82   : > { %p1997_p0 = pneg %p1996_p11  ;;  %p2003_p13 = por %p2002_p10, %p2001_p5 }
  0x84   : > { %p2004_p9 = pnand %p2003_p13, %p1997_p0 }
  0x86   : > { %2007 = shalt.err (!%p2004_p9)
}
  0x87   : > { %1732 = dma.hbm_to_vmem [thread:$0]  (!%p2345_p8), %s2339_s25, 64, %s2341_s9, %s247_s10  }
  0x88   : > { %s1459_s6 = sshll.u32 %s2128_s22, 7  ;;  %s269_s11 = scalar_lea.vmem [#allocation5], %s1458_s16 }
  0x89   : > { %s2381_s29 = scalar_lea.hbm %s2540_s1, %s1459_s6  ;;  %s277_s15 = sshll.u32 %s269_s11, 4  ;;  %s278_s15 = int_to_ptr.vmem [resolvable:$true] %s277_s15 }
  0x8a   : > { %s2563_s2 = sand.u32 1, %s2132_s23   ;;  %s2008_s3 = scalar_lea.hbm %s2381_s29, 128 }
  0x8b   : > { %s266_s0 = scalar_lea.sflag [#allocation6], %s2563_s2  ;;  %p2009_p7 = scmp.ne.s32.totalorder %s2381_s29, %s2008_s3 }
  0x8c   : > { %s2013_s10 = scalar_lea.hbm %s2540_s1, 256  ;;  %p2014_p4 = scmp.lt.u32.totalorder %s2381_s29, %s2540_s1 }
  0x8d   : > { %p2011_p12 = pnand %p2009_p7, %p1980_p3  ;;  %p2015_p6 = scmp.lt.u32.totalorder %s2013_s10, %s2008_s3 }
  0x8e   : > { %p2017_p0 = scmp.lt.u32.totalorder %s2008_s3, %s2381_s29 }
  0x8f   : > { %p2012_p2 = pneg %p2011_p12  ;;  %p2016_p11 = por %p2015_p6, %p2014_p4 }
  0x91   : > { %p2018_p5 = por %p2017_p0, %p2016_p11 }
  0x93   : > { %p2019_p10 = pnand %p2018_p5, %p2012_p2 }
  0x95   : > { %2022 = shalt.err (!%p2019_p10)
}
  0x96   : > { %s2023_s16 = scalar_lea.vmem %s278_s15, 128  ;;  %s2140_s17 = smov [#allocation5]  }
  0x97   : > { %p2024_p13 = scmp.ne.s32.totalorder %s278_s15, %s2023_s16  ;;  %s2028_s30 = sshll.u32 %s2140_s17, 4  ;;  %s2029_s30 = int_to_ptr.vmem [resolvable:$false] %s2028_s30 }
  0x98   : > { %s2030_s11 = scalar_lea.vmem %s2029_s30, 256  ;;  %p2031_p12 = scmp.lt.s32.totalorder %s278_s15, %s2029_s30 }
  0x99   : > { %p2026_p9 = pnand %p2024_p13, %p1980_p3  ;;  %p2032_p1 = scmp.lt.s32.totalorder %s2030_s11, %s2023_s16 }
  0x9b   : > { %p2027_p7 = pneg %p2026_p9  ;;  %p2033_p4 = por %p2032_p1, %p2031_p12 }
  0x9d   : > { %p2034_p6 = pnand %p2033_p4, %p2027_p7 }
  0x9f   : > { %2037 = shalt.err (!%p2034_p6)
}
  0xa0   : > { %1735 = dma.hbm_to_vmem [thread:$0]  (!%p2345_p8), %s2381_s29, 128, %s278_s15, %s266_s0  }
  0xa1   : > { %p2564_p2 = scmp.ne.s32.totalorder %s2554_s28, 0 }
  0xa2   : > { %s2409_s3 = sand.u32 (!%p2564_p2), 1, %s2116_s19   ;;  %p2565_p1 = scmp.ne.s32.totalorder (!%p2564_p2), %s2552_s26, 0 }
  0xa3   : > { %286 = sbr.rel (%p2564_p2) target bundleno = 633 (0x279), region = 40  ;;  %s1461_s2 = sshll.u32 (!%p2564_p2), %s2409_s3, 2 }
  0xa4   : > { %s289_s25 = scalar_lea.sflag (!%p2564_p2), [#allocation3], %s2409_s3  ;;  %s2413_s9 = scalar_lea.vmem (!%p2564_p2), [#allocation2], %s1461_s2 }
  0xaa   : > { %2091 = dma.done.wait (%p2565_p1), %s289_s25, 64  }
  0xab   : > { %2093 = vsyncadd (%p2565_p1), %s289_s25, 4294967232  ;;  %s297_s0 = sand.u32 1, %s2210_s24   ;;  %s1462_s28 = sshll.u32 %s2409_s3, 3 }
  0xac   : > { %s298_s7 = scalar_lea.sflag [#allocation6], %s297_s0  ;;  %s301_s29 = scalar_lea.vmem [#allocation5], %s1462_s28 }
  0xad   : > { %2095 = dma.done.wait (%p2565_p1), %s298_s7, 128  }
  0xae   : > { %2097 = vsyncadd (%p2565_p1), %s298_s7, 4294967168  ;;  %p2566_p8 = scmp.eq.s32.totalorder %s2210_s24, 0 }
  0xb0   : > { %2099 = dma.done.wait (%p2566_p8), [#allocation6], 128   ;;  %p2567_p3 = pmov %p2566_p8 }
  0xb2   : > { %2101 = vsyncadd (%p2567_p3), [#allocation6], 4294967168  ;;  %p2568_p11 = pmov %p2567_p3 }
  0xb3   : > { %p2569_p0 = pmov %p2567_p3 }
  0xb4   : > { %2103 = dma.done.wait (%p2568_p11), [#allocation9], 10240  }
  0xb5   : > { %2105 = vsyncadd (%p2569_p0), [#allocation9], 4294957056  ;;  %v2141_v0 = vmov 2   ;;  %v2142_v1 = vmov 0   ;;  %v346_v2 = vld [vmem:[%s301_s29] sm:$0xff]  ;;  %v1814_v3 = vld [vmem:[#allocation10 + $0x40] sm:$0xff]   ;;  %v347_v40 = vlaneseq }
  0xb6   : > { %1810 = vset.pattern.permute.xlu1 %v2141_v0  ;;  %1808 = vset.pattern.permute.xlu0 %v2142_v1  ;;  %v1815_v4 = vld [vmem:[#allocation10 + $0xc0] sm:$0xff]   ;;  %v2143_v7 = vmov 3   ;;  %v2144_v8 = vmov 1   ;;  %v1818_v9 = vld [vmem:[#allocation10 + $0x48] sm:$0xff]   ;;  %v1822_v13 = vld [vmem:[#allocation10 + $0x50] sm:$0xff]   ;;  %v2145_v14 = vmov 4  }
  0xb7   : > { %371 = vperm.xlu1 %1810, %v346_v2   ;;  %353 = vperm.xlu0 %1808, %v346_v2   ;;  %v1816_v5 = vld [vmem:[#allocation10] sm:$0xff]   ;;  %v1819_v10 = vld [vmem:[#allocation10 + $0xc8] sm:$0xff]   ;;  %v1823_v15 = vld [vmem:[#allocation10 + $0xd0] sm:$0xff]   ;;  %v2146_v39 = vmov 0.0   ;;  %v348_v41 = vand.u32 127, %v347_v40  ;;  %v2570_v49 = vmov 0 }
  0xb8   : > { %1555 = vmatprep.subr.bf16.mxu0 %v1814_v3  ;;  %1577 = vmatprep.subr.bf16.mxu1 %v1815_v4  ;;  %v1817_v6 = vld [vmem:[#allocation10 + $0x80] sm:$0xff]   ;;  %v1820_v11 = vld [vmem:[#allocation10 + $0x8] sm:$0xff]   ;;  %v1824_v16 = vld [vmem:[#allocation10 + $0x10] sm:$0xff]   ;;  %v2572_v50 = vmov 0  ;;  %s1552_s24 = sshll.u32 %s2124_s21, 7  ;;  %s344_s26 = scalar_lea.vmem [#allocation11], %s1462_s28 }
  0xb9   : > { %1556 = vmatpush3.bf16.msra.mxu0 %v1816_v5  ;;  %1578 = vmatpush3.bf16.msra.mxu1 %v1817_v6  ;;  %v1821_v12 = vld [vmem:[#allocation10 + $0x88] sm:$0xff]   ;;  %v1825_v17 = vld [vmem:[#allocation10 + $0x90] sm:$0xff]   ;;  %v1826_v18 = vld [vmem:[#allocation10 + $0x58] sm:$0xff]   ;;  %v349_v44 = vadd.s32 128, %v348_v41  ;;  %v350_v45 = vadd.s32 256, %v348_v41  ;;  %v351_v47 = vadd.s32 384, %v348_v41  ;;  %s2490_s6 = scalar_lea.hbm %s2544_s5, %s1552_s24 }
  0xba   : > { %1557 = vmatprep.subr.bf16.mxu0 %v1818_v9  ;;  %1579 = vmatprep.subr.bf16.mxu1 %v1819_v10  ;;  %v1827_v19 = vld [vmem:[#allocation10 + $0xd8] sm:$0xff]   ;;  %v1830_v22 = vld [vmem:[#allocation10 + $0x60] sm:$0xff]   ;;  %v1834_v26 = vld [vmem:[#allocation10 + $0x68] sm:$0xff]   ;;  %s1315_s15 = sshll.u32 %s344_s26, 4  ;;  %s1301_s16 = scalar_lea.sflag [#allocation4], %s2409_s3  ;;  %s2492_s15 = int_to_ptr.vmem [resolvable:$true] %s1315_s15 }
  0xbb   : > { %1811 = vset.pattern.permute.xlu1 %v2143_v7  ;;  %1809 = vset.pattern.permute.xlu0 %v2144_v8  ;;  %v1828_v20 = vld [vmem:[#allocation10 + $0x18] sm:$0xff]   ;;  %v1831_v23 = vld [vmem:[#allocation10 + $0xe0] sm:$0xff]   ;;  %v1835_v27 = vld [vmem:[#allocation10 + $0xe8] sm:$0xff]   ;;  %s2038_s21 = scalar_lea.vmem %s2492_s15, 128  ;;  %p2576_p10 = scmp.ne.s32.totalorder %s2560_s8, 0 }
  0xbc   : > { %382 = vperm.xlu1 %1811, %v346_v2   ;;  %360 = vperm.xlu0 %1809, %v346_v2   ;;  %v1829_v21 = vld [vmem:[#allocation10 + $0x98] sm:$0xff]   ;;  %v1832_v24 = vld [vmem:[#allocation10 + $0x20] sm:$0xff]   ;;  %v1836_v28 = vld [vmem:[#allocation10 + $0x28] sm:$0xff]   ;;  %p2039_p5 = scmp.ne.s32.totalorder %s2492_s15, %s2038_s21  ;;  %s2148_s17 = smov [#allocation11]  }
  0xbd   : > { %1558 = vmatpush3.bf16.msra.mxu0 %v1820_v11  ;;  %1580 = vmatpush3.bf16.msra.mxu1 %v1821_v12  ;;  %v1833_v25 = vld [vmem:[#allocation10 + $0xa0] sm:$0xff]   ;;  %v1837_v29 = vld [vmem:[#allocation10 + $0xa8] sm:$0xff]   ;;  %v1838_v30 = vld [vmem:[#allocation10 + $0x70] sm:$0xff]   ;;  %s2042_s30 = sshll.u32 %s2148_s17, 4  ;;  %s2043_s30 = int_to_ptr.vmem [resolvable:$false] %s2042_s30 }
  0xbe   : > { %1559 = vmatprep.subr.bf16.mxu0 %v1822_v13  ;;  %1581 = vmatprep.subr.bf16.mxu1 %v1823_v15  ;;  %v1839_v31 = vld [vmem:[#allocation10 + $0xf0] sm:$0xff]   ;;  %v1842_v34 = vld [vmem:[#allocation10 + $0x78] sm:$0xff]   ;;  %v1846_v38 = vld [vmem:[#allocation8 + $0x40] sm:$0xff]   ;;  %p2040_p13 = pnand %p2039_p5, %p2576_p10  ;;  %s2044_s11 = scalar_lea.vmem %s2043_s30, 256 }
  0xbf   : > { %v1840_v32 = vld [vmem:[#allocation10 + $0x30] sm:$0xff]   ;;  %v1843_v35 = vld [vmem:[#allocation10 + $0xf8] sm:$0xff]   ;;  %v1847_v57 = vld [vmem:[#allocation10 + $0x100] sm:$0xff]   ;;  %p2045_p7 = scmp.lt.s32.totalorder %s2492_s15, %s2043_s30  ;;  %p2046_p12 = scmp.lt.s32.totalorder %s2044_s11, %s2038_s21 }
  0xc0   : > { %1812 = vset.pattern.permute.xlu1 %v2145_v14  ;;  %1813 = vset.pattern.permute.xlu0 %v2145_v14  ;;  %v1841_v33 = vld [vmem:[#allocation10 + $0xb0] sm:$0xff]   ;;  %v1844_v36 = vld [vmem:[#allocation10 + $0x38] sm:$0xff]   ;;  %v1848_v61 = vld [vmem:[#allocation8] sm:$0xff]   ;;  %p2041_p9 = pneg %p2040_p13 }
  0xc1   : > { %393 = vperm.xlu1 %1812, %v346_v2   ;;  %1560 = vmatpush3.bf16.msra.mxu0 %v1824_v16  ;;  %v1845_v37 = vld [vmem:[#allocation10 + $0xb8] sm:$0xff]   ;;  %v1849_v62 = vld [vmem:[#allocation8 + $0x48] sm:$0xff]   ;;  %v1852_v1 = vld [vmem:[#allocation8 + $0x50] sm:$0xff]   ;;  %p2047_p4 = por %p2046_p12, %p2045_p7 }
  0xc2   : > { %1582 = vmatpush3.bf16.msra.mxu1 %v1825_v17  ;;  %1561 = vmatprep.subr.bf16.mxu0 %v1826_v18  ;;  %v1850_v63 = vld [vmem:[#allocation10 + $0x108] sm:$0xff]   ;;  %v1853_v2 = vld [vmem:[#allocation10 + $0x110] sm:$0xff]   ;;  %v1855_v4 = vld [vmem:[#allocation8 + $0x58] sm:$0xff]  }
  0xc3   : > { %1583 = vmatprep.subr.bf16.mxu1 %v1827_v19  ;;  %v1851_v0 = vld [vmem:[#allocation8 + $0x8] sm:$0xff]   ;;  %v1854_v3 = vld [vmem:[#allocation8 + $0x10] sm:$0xff]   ;;  %v1856_v5 = vld [vmem:[#allocation10 + $0x118] sm:$0xff]   ;;  %p2048_p6 = pnand %p2047_p4, %p2041_p9 }
  0xc4   : > { %v1857_v6 = vld [vmem:[#allocation8 + $0x18] sm:$0xff]   ;;  %v1858_v7 = vld [vmem:[#allocation8 + $0x60] sm:$0xff]   ;;  %v1861_v10 = vld [vmem:[#allocation8 + $0x68] sm:$0xff]  }
  0xc5   : > { %1562 = vmatpush3.bf16.msra.mxu0 %v1828_v20  ;;  %v1859_v8 = vld [vmem:[#allocation10 + $0x120] sm:$0xff]   ;;  %v1862_v11 = vld [vmem:[#allocation10 + $0x128] sm:$0xff]   ;;  %v1864_v13 = vld [vmem:[#allocation8 + $0x70] sm:$0xff]  }
  0xc6   : > { %1584 = vmatpush3.bf16.msra.mxu1 %v1829_v21  ;;  %1563 = vmatprep.subr.bf16.mxu0 %v1830_v22  ;;  %v1860_v9 = vld [vmem:[#allocation8 + $0x20] sm:$0xff]   ;;  %v1863_v12 = vld [vmem:[#allocation8 + $0x28] sm:$0xff]   ;;  %v1865_v14 = vld [vmem:[#allocation10 + $0x130] sm:$0xff]  }
  0xc7   : > { %1585 = vmatprep.subr.bf16.mxu1 %v1831_v23  ;;  %v1866_v15 = vld [vmem:[#allocation8 + $0x30] sm:$0xff]   ;;  %v1867_v16 = vld [vmem:[#allocation8 + $0x78] sm:$0xff]   ;;  %v1870_v18 = vld [vmem:[#allocation8 + $0xc0] sm:$0xff]  }
  0xc8   : > { %v1868_v17 = vld [vmem:[#allocation10 + $0x138] sm:$0xff]   ;;  %v415_v20 = vld [vmem:[%s2413_s9] sm:$0xf]  ;;  %v1873_v22 = vld [vmem:[#allocation8 + $0xc8] sm:$0xff]  }
  0xc9   : > { %1564 = vmatpush3.bf16.msra.mxu0 %v1832_v24  ;;  %v1869_v19 = vld [vmem:[#allocation8 + $0x38] sm:$0xff]   ;;  %v1871_v21 = vld [vmem:[#allocation8 + $0x80] sm:$0xff]   ;;  %v1874_v24 = vld [vmem:[#allocation8 + $0x88] sm:$0xff]  }
  0xca   : > { %1586 = vmatpush3.bf16.msra.mxu1 %v1833_v25  ;;  %1565 = vmatprep.subr.bf16.mxu0 %v1834_v26  ;;  %v1872_v23 = vld [vmem:[#allocation8 + $0x100] sm:$0xff]   ;;  %v1876_v25 = vld [vmem:[#allocation8 + $0xd0] sm:$0xff]   ;;  %v1875_v26 = vld [vmem:[#allocation8 + $0x108] sm:$0xff]  }
  0xcb   : > { %1587 = vmatprep.subr.bf16.mxu1 %v1835_v27  ;;  %v1877_v27 = vld [vmem:[#allocation8 + $0x90] sm:$0xff]  }
  0xcc   : > { %v1889_v40 = vld [vmem:[#allocation8 + $0xb0] sm:$0xff]  }
  0xcd   : > { %1566 = vmatpush3.bf16.msra.mxu0 %v1836_v28  ;;  %v1879_v28 = vld [vmem:[#allocation8 + $0xd8] sm:$0xff]  }
  0xce   : > { %1588 = vmatpush3.bf16.msra.mxu1 %v1837_v29  ;;  %1567 = vmatprep.subr.bf16.mxu0 %v1838_v30  ;;  %v1878_v29 = vld [vmem:[#allocation8 + $0x110] sm:$0xff]   ;;  %v1880_v30 = vld [vmem:[#allocation8 + $0x98] sm:$0xff]  }
  0xcf   : > { %1589 = vmatprep.subr.bf16.mxu1 %v1839_v31  ;;  %v1882_v31 = vld [vmem:[#allocation8 + $0xe0] sm:$0xff]  }
  0xd1   : > { %1568 = vmatpush3.bf16.msra.mxu0 %v1840_v32  ;;  %v1881_v32 = vld [vmem:[#allocation8 + $0x118] sm:$0xff]  }
  0xd2   : > { %1590 = vmatpush3.bf16.msra.mxu1 %v1841_v33  ;;  %1569 = vmatprep.subr.bf16.mxu0 %v1842_v34  ;;  %v1883_v33 = vld [vmem:[#allocation8 + $0xa0] sm:$0xff]   ;;  %v1885_v34 = vld [vmem:[#allocation8 + $0xe8] sm:$0xff]  }
  0xd3   : > { %1591 = vmatprep.subr.bf16.mxu1 %v1843_v35  ;;  %v1884_v35 = vld [vmem:[#allocation8 + $0x120] sm:$0xff]  }
  0xd5   : > { %1570 = vmatpush3.bf16.msra.mxu0 %v1844_v36  ;;  %v1886_v36 = vld [vmem:[#allocation8 + $0xa8] sm:$0xff]  }
  0xd6   : > { %1592 = vmatpush3.bf16.msra.mxu1 %v1845_v37  ;;  %1661 = vmatprep.subr.bf16.mxu0 %v2146_v39  ;;  %v1888_v37 = vld [vmem:[#allocation8 + $0xf0] sm:$0xff]  }
  0xd7   : > { %1608 = vmatprep.subr.bf16.mxu1 %v1846_v38  ;;  %v1887_v38 = vld [vmem:[#allocation8 + $0x128] sm:$0xff]  }
 0x136   : > { %v372_v42 = vpop.permute.xlu1 %371  ;;  %v354_v43 = vpop.permute.xlu0 %353 }
 0x137   : > { %vm355_vm0 = vcmp.eq.s32.totalorder %v348_v41, %v354_v43  ;;  %vm356_vm3 = vcmp.eq.s32.totalorder %v349_v44, %v354_v43  ;;  %vm357_vm7 = vcmp.eq.s32.totalorder %v350_v45, %v354_v43  ;;  %vm358_vm9 = vcmp.eq.s32.totalorder %v351_v47, %v354_v43  ;;  %v1892_v43 = vld [vmem:[#allocation8 + $0xb8] sm:$0xff]  }
 0x138   : > { %vm373_vm11 = vcmp.eq.s32.totalorder %v348_v41, %v372_v42  ;;  %vm375_vm13 = vcmp.eq.s32.totalorder %v350_v45, %v372_v42 }
 0x13b   : > { %v383_v46 = vpop.permute.xlu1 %382  ;;  %v361_v48 = vpop.permute.xlu0 %360 }
 0x13c   : > { %vm362_vm1 = vcmp.eq.s32.totalorder %v348_v41, %v361_v48  ;;  %vm363_vm2 = vcmp.eq.s32.totalorder %v349_v44, %v361_v48  ;;  %vm364_vm4 = vcmp.eq.s32.totalorder %v350_v45, %v361_v48  ;;  %vm365_vm5 = vcmp.eq.s32.totalorder %v351_v47, %v361_v48 }
 0x13d   : > { %vm366_vm6 = vmor %vm355_vm0, %vm362_vm1  ;;  %vm384_vm15 = vcmp.eq.s32.totalorder %v348_v41, %v383_v46 }
 0x13e   : > { %vm2436_vm8 = vmor %vm356_vm3, %vm363_vm2  ;;  %vm386_vm2 = vcmp.eq.s32.totalorder %v350_v45, %v383_v46 }
 0x13f   : > { %v2571_v49 = vsel %vm2436_vm8, 4294967295, %v2570_v49  ;;  %vm368_vm10 = vmor %vm357_vm7, %vm364_vm4 }
 0x140   : > { %vm2440_vm12 = vmor %vm358_vm9, %vm365_vm5  ;;  %v394_v51 = vpop.permute.xlu1 %393 }
 0x141   : > { %v2573_v50 = vsel %vm2440_vm12, 4294967295, %v2572_v50  ;;  %vm377_vm14 = vmor %vm366_vm6, %vm373_vm11  ;;  %vm395_vm1 = vcmp.eq.s32.totalorder %v348_v41, %v394_v51  ;;  %vm397_vm8 = vcmp.eq.s32.totalorder %v350_v45, %v394_v51  ;;  %vm396_vm5 = vcmp.eq.s32.totalorder %v349_v44, %v394_v51  ;;  %v1891_v41 = vld [vmem:[#allocation8 + $0xf8] sm:$0xff]  }
 0x142   : > { %vm379_vm0 = vmor %vm368_vm10, %vm375_vm13  ;;  %vm374_vm12 = vcmp.eq.s32.totalorder %v349_v44, %v372_v42  ;;  %vm2574_vm6 = vnez %v2571_v49  ;;  %vm385_vm10 = vcmp.eq.s32.totalorder %v349_v44, %v383_v46  ;;  %v1893_v44 = vld [vmem:[#allocation8 + $0x138] sm:$0xff]  }
 0x143   : > { %vm388_vm3 = vmor %vm377_vm14, %vm384_vm15  ;;  %vm398_vm14 = vcmp.eq.s32.totalorder %v351_v47, %v394_v51 }
 0x144   : > { %vm390_vm4 = vmor %vm379_vm0, %vm386_vm2  ;;  %vm376_vm0 = vcmp.eq.s32.totalorder %v351_v47, %v372_v42  ;;  %vm2575_vm2 = vnez %v2573_v50  ;;  %v1890_v42 = vld [vmem:[#allocation8 + $0x130] sm:$0xff]  }
 0x145   : > { %vm399_vm7 = vmor %vm388_vm3, %vm395_vm1  ;;  %vm387_vm3 = vcmp.eq.s32.totalorder %v351_v47, %v383_v46 }
 0x146   : > { %vm401_vm9 = vmor %vm390_vm4, %vm397_vm8  ;;  %v1467_v52 = vsel %vm399_vm7, 1.0, %v2146_v39  ;;  %vm2147_vm4 = vmmov 0   ;;  %vm1298_vm7 = vcmask 261120  }
 0x147   : > { %vm378_vm11 = vmor %vm2574_vm6, %vm374_vm12  ;;  %v2450_v54 = vpack.c.bf16 %v1467_v52, %v1467_v52  ;;  %v1469_v55 = vsel %vm401_vm9, 1.0, %v2146_v39 }
 0x148   : > { %vm389_vm13 = vmor %vm378_vm11, %vm385_vm10  ;;  %v2454_v59 = vpack.c.bf16 %v1469_v55, %v1469_v55 }
 0x149   : > { %vm400_vm15 = vmor %vm389_vm13, %vm396_vm5 }
 0x14a   : > { %v1468_v53 = vsel %vm400_vm15, 1.0, %v2146_v39  ;;  %vm380_vm1 = vmor %vm2575_vm2, %vm376_vm0 }
 0x14b   : > { %v412_v56 = vpack.c.bf16 %v1468_v53, %v1468_v53  ;;  %vm391_vm8 = vmor %vm380_vm1, %vm387_vm3 }
 0x14c   : > { %vm402_vm12 = vmor %vm391_vm8, %vm398_vm14 }
 0x14d   : > { %848 = vmatprep.mubr.bf16.mxu0 %v412_v56  ;;  %v1470_v58 = vsel %vm402_vm12, 1.0, %v2146_v39 }
 0x14e   : > { %v2456_v60 = vpack.c.bf16 %v1470_v58, %v1470_v58  ;;  %849 = vmatmul.mubr.bf16.vlgmr.msra.gmra.mrb[0].mxu0 %v2450_v54 }
 0x14f   : > { %1662 = vmatpush3.bf16.msra.mxu0 %v1847_v57  ;;  %1677 = vmatprep.mubr.msk.bf16.mxu0 %vm2147_vm4, %v2146_v39 }
 0x150   : > { %888 = vmatprep.mubr.bf16.mxu1 %v2456_v60  ;;  %1663 = vmatprep.subr.bf16.mxu0 %v2146_v39 }
 0x151   : > { %889 = vmatmul.mubr.bf16.vlgmr.msra.gmra.mrb[0].mxu1 %v2454_v59 }
 0x152   : > { %1609 = vmatpush3.bf16.msra.mxu1 %v1848_v61  ;;  %1208 = vmatprep.mubr.bf16.mxu1 %v412_v56 }
 0x153   : > { %1610 = vmatprep.subr.bf16.mxu1 %v1849_v62  ;;  %1664 = vmatpush3.bf16.msra.mxu0 %v1850_v63 }
 0x154   : > { %1665 = vmatprep.subr.bf16.mxu0 %v2146_v39 }
 0x156   : > { %1611 = vmatpush3.bf16.msra.mxu1 %v1851_v0 }
 0x157   : > { %1612 = vmatprep.subr.bf16.mxu1 %v1852_v1  ;;  %1666 = vmatpush3.bf16.msra.mxu0 %v1853_v2 }
 0x158   : > { %1667 = vmatprep.subr.bf16.mxu0 %v2146_v39 }
 0x15a   : > { %1613 = vmatpush3.bf16.msra.mxu1 %v1854_v3 }
 0x15b   : > { %1614 = vmatprep.subr.bf16.mxu1 %v1855_v4  ;;  %1668 = vmatpush3.bf16.msra.mxu0 %v1856_v5 }
 0x15c   : > { %1669 = vmatprep.subr.bf16.mxu0 %v2146_v39 }
 0x15e   : > { %1615 = vmatpush3.bf16.msra.mxu1 %v1857_v6 }
 0x15f   : > { %1616 = vmatprep.subr.bf16.mxu1 %v1858_v7  ;;  %1670 = vmatpush3.bf16.msra.mxu0 %v1859_v8 }
 0x160   : > { %1671 = vmatprep.subr.bf16.mxu0 %v2146_v39 }
 0x162   : > { %1617 = vmatpush3.bf16.msra.mxu1 %v1860_v9 }
 0x163   : > { %1618 = vmatprep.subr.bf16.mxu1 %v1861_v10  ;;  %1672 = vmatpush3.bf16.msra.mxu0 %v1862_v11  ;;  %v1296_v10 = vld [vmem:[#allocation7] sm:$0xff] }
 0x164   : > { %1673 = vmatprep.subr.bf16.mxu0 %v2146_v39 }
 0x166   : > { %1619 = vmatpush3.bf16.msra.mxu1 %v1863_v12 }
 0x167   : > { %1620 = vmatprep.subr.bf16.mxu1 %v1864_v13  ;;  %1674 = vmatpush3.bf16.msra.mxu0 %v1865_v14 }
 0x168   : > { %1675 = vmatprep.subr.bf16.mxu0 %v2146_v39 }
 0x16a   : > { %1621 = vmatpush3.bf16.msra.mxu1 %v1866_v15 }
 0x16b   : > { %1622 = vmatprep.subr.bf16.mxu1 %v1867_v16  ;;  %1676 = vmatpush3.bf16.msra.mxu0 %v1868_v17 }
 0x16c   : > { %1630 = vmatprep.subr.bf16.mxu0 %v1870_v18 }
 0x16e   : > { %1623 = vmatpush3.bf16.msra.mxu1 %v1869_v19  ;;  %1678 = vmatmul.mubr.bf16.vlgmr.msra.gmra.mrb[4].mxu0 %v415_v20 }
 0x16f   : > { %1631 = vmatpush3.bf16.msra.mxu0 %v1871_v21  ;;  %1248 = vmatprep.mubr.bf16.mxu0 %v2456_v60 }
 0x170   : > { %1681 = vmatprep.subr.bf16.mxu1 %v2146_v39  ;;  %1632 = vmatprep.subr.bf16.mxu0 %v1873_v22 }
 0x171   : > { %1209 = vmatmul.mubr.bf16.vlgmr.msra.gmra.mrb[4].mxu1 %v2450_v54 }
 0x172   : > { %1682 = vmatpush3.bf16.msra.mxu1 %v1872_v23  ;;  %1697 = vmatprep.mubr.msk.bf16.mxu1 %vm2147_vm4, %v2146_v39 }
 0x173   : > { %1633 = vmatpush3.bf16.msra.mxu0 %v1874_v24  ;;  %1683 = vmatprep.subr.bf16.mxu1 %v2146_v39 }
 0x174   : > { %1634 = vmatprep.subr.bf16.mxu0 %v1876_v25 }
 0x176   : > { %1684 = vmatpush3.bf16.msra.mxu1 %v1875_v26 }
 0x177   : > { %1635 = vmatpush3.bf16.msra.mxu0 %v1877_v27  ;;  %1685 = vmatprep.subr.bf16.mxu1 %v2146_v39 }
 0x178   : > { %1636 = vmatprep.subr.bf16.mxu0 %v1879_v28 }
 0x17a   : > { %1686 = vmatpush3.bf16.msra.mxu1 %v1878_v29 }
 0x17b   : > { %1637 = vmatpush3.bf16.msra.mxu0 %v1880_v30  ;;  %1687 = vmatprep.subr.bf16.mxu1 %v2146_v39 }
 0x17c   : > { %1638 = vmatprep.subr.bf16.mxu0 %v1882_v31 }
 0x17e   : > { %1688 = vmatpush3.bf16.msra.mxu1 %v1881_v32 }
 0x17f   : > { %1639 = vmatpush3.bf16.msra.mxu0 %v1883_v33  ;;  %1689 = vmatprep.subr.bf16.mxu1 %v2146_v39 }
 0x180   : > { %1640 = vmatprep.subr.bf16.mxu0 %v1885_v34 }
 0x182   : > { %1690 = vmatpush3.bf16.msra.mxu1 %v1884_v35 }
 0x183   : > { %1641 = vmatpush3.bf16.msra.mxu0 %v1886_v36  ;;  %1691 = vmatprep.subr.bf16.mxu1 %v2146_v39 }
 0x184   : > { %1642 = vmatprep.subr.bf16.mxu0 %v1888_v37 }
 0x186   : > { %1692 = vmatpush3.bf16.msra.mxu1 %v1887_v38 }
 0x187   : > { %1643 = vmatpush3.bf16.msra.mxu0 %v1889_v40  ;;  %1693 = vmatprep.subr.bf16.mxu1 %v2146_v39 }
 0x188   : > { %1644 = vmatprep.subr.bf16.mxu0 %v1891_v41 }
 0x18a   : > { %1694 = vmatpush3.bf16.msra.mxu1 %v1890_v42 }
 0x18b   : > { %1645 = vmatpush3.bf16.msra.mxu0 %v1892_v43  ;;  %1695 = vmatprep.subr.bf16.mxu1 %v2146_v39 }
 0x18e   : > { %1696 = vmatpush3.bf16.msra.mxu1 %v1893_v44  ;;  %1249 = vmatmul.mubr.bf16.vlgmr.msra.gmra.mrb[8].mxu0 %v2454_v59 }
 0x191   : > { %1698 = vmatmul.mubr.bf16.vlgmr.msra.gmra.mrb[8].mxu1 %v415_v20 }
 0x221   : > { %v1571_v45 = vpop.f32.mrb[0].mxu0 }
 0x222   : > { %v1572_v46 = vpop.f32.mrb[1].mxu0 }
 0x223   : > { %v1573_v47 = vadd.f32 %v1572_v46, %v1571_v45  ;;  %v1574_v48 = vpop.f32.mrb[2].mxu0 }
 0x224   : > { %v1593_v49 = vpop.f32.mrb[0].mxu1  ;;  %v1575_v50 = vpop.f32.mrb[3].mxu0 }
 0x225   : > { %v1594_v51 = vpop.f32.mrb[1].mxu1 }
 0x226   : > { %v1595_v52 = vadd.f32 %v1594_v51, %v1593_v49  ;;  %v1596_v53 = vpop.f32.mrb[2].mxu1 }
 0x227   : > { %v1597_v54 = vpop.f32.mrb[3].mxu1 }
 0x228   : > { %v891_v55 = vadd.f32 %v1595_v52, %v1573_v47 }
 0x241   : > { %v930_v56 = vpop.f32.mrb[4].mxu0 }
 0x242   : > { %v931_v57 = vadd.f32 %v930_v56, %v891_v55  ;;  %v1679_v58 = vpop.f32.mrb[5].mxu0 }
 0x243   : > { %v933_v60 = vpop.f32.mrb[6].mxu0 }
 0x244   : > { %v1624_v39 = vpop.f32.mrb[4].mxu1  ;;  %v1680_v61 = vpop.f32.mrb[7].mxu0 }
 0x245   : > { %v1625_v59 = vpop.f32.mrb[5].mxu1 }
 0x246   : > { %v1626_v62 = vadd.f32 %v1625_v59, %v1624_v39  ;;  %v1627_v63 = vpop.f32.mrb[6].mxu1 }
 0x247   : > { %v1628_v0 = vpop.f32.mrb[7].mxu1 }
 0x248   : > { %v1211_v1 = vadd.f32 %v1626_v62, %v931_v57 }
 0x261   : > { %v1646_v2 = vpop.f32.mrb[8].mxu0 }
 0x262   : > { %v1647_v3 = vpop.f32.mrb[9].mxu0 }
 0x263   : > { %v1648_v4 = vadd.f32 %v1647_v3, %v1646_v2  ;;  %v1649_v5 = vpop.f32.mrb[10].mxu0 }
 0x264   : > { %v1290_v6 = vpop.f32.mrb[8].mxu1  ;;  %v1650_v7 = vpop.f32.mrb[11].mxu0 }
 0x265   : > { %v1251_v8 = vadd.f32 %v1648_v4, %v1211_v1  ;;  %v1699_v9 = vpop.f32.mrb[9].mxu1 }
 0x266   : > { %v1293_v11 = vpop.f32.mrb[10].mxu1 }
 0x267   : > { %v1291_v12 = vadd.f32 %v1290_v6, %v1251_v8  ;;  %v1700_v13 = vpop.f32.mrb[11].mxu1 }
 0x269   : > { %v1297_v14 = vadd.f32 %v1296_v10, %v1291_v12 }
 0x26b   : > { %1299 = vst.msk [vmem:[%s344_s26] sm:$0xff] %vm1298_vm7, %v1297_v14 }
 0x26c   : > { %2051 = shalt.err (!%p2048_p6)
}
 0x26d   : > { %s2052_s3 = scalar_lea.hbm %s2490_s6, 128  ;;  %s2056_s9 = scalar_lea.hbm %s2544_s5, 256 }
 0x26e   : > { %p2053_p2 = scmp.ne.s32.totalorder %s2490_s6, %s2052_s3  ;;  %p2057_p3 = scmp.lt.u32.totalorder %s2490_s6, %s2544_s5 }
 0x26f   : > { %p2058_p11 = scmp.lt.u32.totalorder %s2056_s9, %s2052_s3  ;;  %p2060_p5 = scmp.lt.u32.totalorder %s2052_s3, %s2490_s6 }
 0x270   : > { %p2054_p1 = pnand %p2053_p2, %p2576_p10 }
 0x271   : > { %p2059_p0 = por %p2058_p11, %p2057_p3 }
 0x272   : > { %p2055_p8 = pneg %p2054_p1 }
 0x273   : > { %p2061_p13 = por %p2060_p5, %p2059_p0 }
 0x275   : > { %p2062_p9 = pnand %p2061_p13, %p2055_p8 }
 0x277   : > { %2065 = shalt.err (!%p2062_p9)
}
 0x278   : > { %1717 = dma.vmem_to_hbm [thread:$0]  (%p2576_p10), %s2492_s15, 128, %s2490_s6, %s1301_s16  }
 0x279 PF: > { %s1327_s7 = sand.u32 1, %s2112_s18   ;;  %p2577_p7 = scmp.ne.s32.totalorder %s2553_s27, 0 }
 0x27a   : > { %p2578_p12 = scmp.ge.s32.totalorder %s2132_s23, 2  ;;  %s1328_s29 = scalar_lea.sflag [#allocation4], %s1327_s7 }
 0x27c   : > { %p1737_p4 = pnand %p2578_p12, %p2577_p7 }
 0x27e   : > { %2107 = dma.done.wait (!%p1737_p4), %s1328_s29, 128  }
 0x27f   : > { %2109 = vsyncadd (!%p1737_p4), %s1328_s29, 4294967168  ;;  %s25_s23 = sadd.s32 1, %s2132_s23   ;;  %s2579_s18 = smov %s2116_s19 }
 0x280   : > { %p22_p6 = scmp.ge.s32.totalorder %s25_s23, 4   ;;  %s2580_s19 = smov %s2120_s20 }
 0x281   : > { %s2581_s20 = smov %s2334_s14  ;;  %s2582_s21 = smov %s2128_s22 }
 0x282   : > { %s2583_s22 = smov %s2585_s12  ;;  %24 = sbr.rel (!%p22_p6) target bundleno = 13 (0xd), region = 111 }
 0x289   :  { %1333 = vsyncpa [#allocation3], 1 }
 0x28a   :  { %1335 = vsyncpa [#allocation3 + $0x1], 1 }
 0x28b   :  { %1336 = vsyncpa [#allocation6], 1 }
 0x28c   :  { %1338 = vsyncpa [#allocation6 + $0x1], 1 }
 0x28d   :  { %1339 = vsyncpa [#allocation9], 1 }
 0x28e   :  { %1340 = vsyncpa [#allocation4], 1 }
 0x28f   :  { %1342 = vsyncpa [#allocation4 + $0x1], 1 }

</bundles_post_ra>
